<compile_context>
chip_gen: v7x
topology: tpu7x:2x2x1
jax: 0.10.0
libtpu: 0.0.40
codegen_flags: <defaults>
</compile_context>

<pallas_src>
import functools

import jax
import jax.numpy as jnp
from jax import lax
from jax.experimental import pallas as pl
from jax.experimental.pallas import tpu as pltpu


def _round_up(n, m):
    return ((n + m - 1) // m) * m


def gru_linear_kernel(
    seq_len, batch_p,           # static (bound via functools.partial)
    x_ref,                      # (S*Bp, D)   bf16 time-major input, batch padded to Bp
    wi_ref,                     # (D, 3*HP)   bf16 packed input->gate weights [r|z|n]
    bi_ref,                     # (1, 3*HP)   f32 packed input biases (b_hr/b_hz folded in)
    wh_ref,                     # (HP, 3*HP)  bf16 packed hidden->gate weights (no bias)
    bhn_ref,                    # (1, HP)     f32 b_hn (stays inside r*(...))
    wo_ref,                     # (HP, OP)    bf16 output head weight (padded)
    bo_ref,                     # (1, OP)     f32 output bias (padded)
    out_ref,                    # (Bp, OP)    f32 lane/sublane-dense output
    xi_ref,                     # scratch (S*Bp, 3*HP) f32: hoisted input preactivations
):
    S, Bp = seq_len, batch_p
    HP = wh_ref.shape[0]

    # (1) Hoisted input projections for ALL timesteps: one bf16 MXU matmul, one aligned
    #     bulk store (no per-timestep distribution loop / tile-crossing slices).
    xi_ref[...] = (
        jnp.dot(x_ref[...], wi_ref[...], preferred_element_type=jnp.float32)
        + bi_ref[...]
    )

    # Hoist the b_hn broadcast out of the recurrence (JAX does not CSE broadcasts in loops).
    bhn = jnp.broadcast_to(bhn_ref[...], (Bp, HP))
    wh = wh_ref[...]

    # (2) Serial recurrence: one fused bf16 (Bp, HP) @ (HP, 3*HP) matmul per step.
    #     Gate order (r, z, n) and b_hn kept inside r*(...) match PyTorch nn.GRU.
    def step(t, h):
        off = pl.multiple_of(t * Bp, Bp)                          # sublane-aligned offset
        ip = xi_ref[pl.ds(off, Bp), :]                            # (Bp, 3*HP) f32
        hp = jnp.dot(h.astype(jnp.bfloat16), wh,
                     preferred_element_type=jnp.float32)          # (Bp, 3*HP) f32
        rz = jax.nn.sigmoid(ip[:, :2 * HP] + hp[:, :2 * HP])      # single EUP pass over r|z
        r = rz[:, :HP]
        z = rz[:, HP:]
        n = jnp.tanh(ip[:, 2 * HP:] + r * (hp[:, 2 * HP:] + bhn))
        return (1.0 - z) * n + z * h

    unroll = S if S <= 8 else 8   # bounded unroll: LLO visibility without vreg blowup
    h_last = lax.fori_loop(0, S, step, jnp.zeros((Bp, HP), jnp.float32), unroll=unroll)

    # (3) Linear head on the final hidden state (full-tile, unmasked store).
    out_ref[...] = (
        jnp.dot(h_last.astype(jnp.bfloat16), wo_ref[...],
                preferred_element_type=jnp.float32)
        + bo_ref[...]
    )


def pack_params(params, input_dim):
    """One-time packing/padding of weights (cache the result; do NOT rebuild per call)."""
    D = input_dim
    H = params["w_hr"].shape[0]
    O = params["w_out"].shape[0]
    HP = _round_up(H, 128)
    OP = _round_up(O, 128)

    def pack_w(ws, rows, rows_pad):
        w_cat = jnp.zeros((rows_pad, 3 * HP), jnp.float32)
        for g, w in enumerate(ws):
            w_cat = w_cat.at[:rows, g * HP:g * HP + H].set(w.T.astype(jnp.float32))
        return w_cat

    w_i = pack_w([params["w_ir"], params["w_iz"], params["w_in"]], D, D)
    w_h = pack_w([params["w_hr"], params["w_hz"], params["w_hn"]], H, HP)

    # b_hr / b_hz sit OUTSIDE the r*(...) term in the PyTorch GRU equations -> fold them
    # into the hoisted input bias. Only b_hn remains inside the recurrence.
    b_i = jnp.zeros((1, 3 * HP), jnp.float32)
    b_i = b_i.at[:, 0 * HP:0 * HP + H].set(
        (params["b_ir"] + params["b_hr"]).reshape(1, H).astype(jnp.float32))
    b_i = b_i.at[:, 1 * HP:1 * HP + H].set(
        (params["b_iz"] + params["b_hz"]).reshape(1, H).astype(jnp.float32))
    b_i = b_i.at[:, 2 * HP:2 * HP + H].set(
        params["b_in"].reshape(1, H).astype(jnp.float32))
    b_hn = jnp.zeros((1, HP), jnp.float32).at[:, :H].set(
        params["b_hn"].reshape(1, H).astype(jnp.float32))

    w_o = jnp.zeros((HP, OP), jnp.float32).at[:H, :O].set(params["w_out"].T.astype(jnp.float32))
    b_o = jnp.zeros((1, OP), jnp.float32).at[:, :O].set(
        params["b_out"].reshape(1, O).astype(jnp.float32))

    return {
        # bf16 MXU operands (single-pass MXU); f32 biases / accumulation preserved.
        "w_i": w_i.astype(jnp.bfloat16),
        "b_i": b_i,
        "w_h": w_h.astype(jnp.bfloat16),
        "b_hn": b_hn,
        "w_o": w_o.astype(jnp.bfloat16),
        "b_o": b_o,
        "dims": (D, H, O, HP, OP),
    }


def gru_linear_forward(x, packed):
    """x: (batch, seq, feature) float32. Returns flat (batch*output_dim,) like out.view(-1)."""
    B, S, D = x.shape
    _, H, O, HP, OP = packed["dims"]
    Bp = _round_up(B, 8)   # sublane-padded batch

    # Time-major like the PyTorch module (x.permute(1,0,2)); pad batch rows with zeros.
    x_tm = jnp.transpose(x, (1, 0, 2)).astype(jnp.float32)             # (S, B, D)
    x_pad = jnp.zeros((S, Bp, D), jnp.float32).at[:, :B, :].set(x_tm)  # (S, Bp, D)
    x_flat = x_pad.reshape(S * Bp, D).astype(jnp.bfloat16)

    ins = [x_flat, packed["w_i"], packed["b_i"], packed["w_h"],
           packed["b_hn"], packed["w_o"], packed["b_o"]]

    def resident_spec(a):
        # Full-array block, constant index: resident in VMEM for the single grid step.
        zeros = (0,) * a.ndim
        return pl.BlockSpec(a.shape, lambda t, zeros=zeros: zeros)

    out_padded = pl.pallas_call(
        functools.partial(gru_linear_kernel, S, Bp),
        out_shape=jax.ShapeDtypeStruct((Bp, OP), jnp.float32),
        grid_spec=pltpu.PrefetchScalarGridSpec(
            num_scalar_prefetch=0,
            grid=(1,),  # single step: the whole recurrence lives inside the kernel
            in_specs=[resident_spec(a) for a in ins],
            out_specs=pl.BlockSpec((Bp, OP), lambda t: (0, 0)),
            scratch_shapes=[pltpu.VMEM((S * Bp, 3 * HP), jnp.float32)],
        ),
        compiler_params=pltpu.CompilerParams(
            dimension_semantics=("arbitrary",),
            vmem_limit_bytes=32 * 1024 * 1024,
        ),
    )(*ins)

    return out_padded[:B, :O].reshape(-1)  # matches out.view(-1)


def make_params(key, input_dim, hidden_dim, output_dim):
    ks = jax.random.split(key, 16)
    s_ih = 1.0 / jnp.sqrt(jnp.float32(input_dim))
    s_hh = 1.0 / jnp.sqrt(jnp.float32(hidden_dim))
    u = lambda k, shape, s: jax.random.uniform(k, shape, jnp.float32, -s, s)
    return {
        "w_ir": u(ks[0], (hidden_dim, input_dim), s_ih),
        "w_iz": u(ks[1], (hidden_dim, input_dim), s_ih),
        "w_in": u(ks[2], (hidden_dim, input_dim), s_ih),
        "w_hr": u(ks[3], (hidden_dim, hidden_dim), s_hh),
        "w_hz": u(ks[4], (hidden_dim, hidden_dim), s_hh),
        "w_hn": u(ks[5], (hidden_dim, hidden_dim), s_hh),
        "b_ir": u(ks[6], (hidden_dim,), s_hh),
        "b_iz": u(ks[7], (hidden_dim,), s_hh),
        "b_in": u(ks[8], (hidden_dim,), s_hh),
        "b_hr": u(ks[9], (hidden_dim,), s_hh),
        "b_hz": u(ks[10], (hidden_dim,), s_hh),
        "b_hn": u(ks[11], (hidden_dim,), s_hh),
        "w_out": u(ks[12], (output_dim, hidden_dim), s_hh),
        "b_out": u(ks[13], (output_dim,), s_hh),
    }


def reference_forward(x, p):
    """Pure-JAX f32 reference with identical PyTorch GRU semantics (for validation)."""
    B, S, D = x.shape
    H = p["w_hr"].shape[0]
    x_tm = jnp.transpose(x, (1, 0, 2))

    def step(h, x_t):
        r = jax.nn.sigmoid(x_t @ p["w_ir"].T + p["b_ir"] + h @ p["w_hr"].T + p["b_hr"])
        z = jax.nn.sigmoid(x_t @ p["w_iz"].T + p["b_iz"] + h @ p["w_hz"].T + p["b_hz"])
        n = jnp.tanh(x_t @ p["w_in"].T + p["b_in"] + r * (h @ p["w_hn"].T + p["b_hn"]))
        h_new = (1.0 - z) * n + z * h
        return h_new, None

    h_last, _ = jax.lax.scan(step, jnp.zeros((B, H), jnp.float32), x_tm)
    return (h_last @ p["w_out"].T + p["b_out"]).reshape(-1)


if __name__ == "__main__":
    input_dim, hidden_dim, output_dim = 16, 32, 8
    batch, seq = 2, 8

    key = jax.random.PRNGKey(0)
    k_x, k_p = jax.random.split(key)
    x = jax.random.normal(k_x, (batch, seq, input_dim), jnp.float32)
    params = make_params(k_p, input_dim, hidden_dim, output_dim)

    packed = pack_params(params, input_dim)   # one-time weight packing (reused per call)

    out = gru_linear_forward(x, packed)
    out = jax.block_until_ready(out)

    ref = reference_forward(x, params)
    assert out.shape == (batch * output_dim,)
    # bf16 MXU operands over the recurrence -> validate with a correspondingly looser tolerance.
    assert jnp.allclose(out, ref, atol=2e-2, rtol=2e-2), (out, ref)

    print("KERNEL_OK")
</pallas_src>

<mosaic_0001>
module attributes {stable_mosaic.version = 11 : i64} {
  func.func @gru_linear_kernel(%arg0: i32, %arg1: memref<64x16xbf16, #tpu.memory_space<vmem>>, %arg2: memref<16x384xbf16, #tpu.memory_space<vmem>>, %arg3: memref<1x384xf32, #tpu.memory_space<vmem>>, %arg4: memref<128x384xbf16, #tpu.memory_space<vmem>>, %arg5: memref<1x128xf32, #tpu.memory_space<vmem>>, %arg6: memref<128x128xbf16, #tpu.memory_space<vmem>>, %arg7: memref<1x128xf32, #tpu.memory_space<vmem>>, %arg8: memref<8x128xf32, #tpu.memory_space<vmem>>, %arg9: memref<64x384xf32, #tpu.memory_space<vmem>>) attributes {dimension_semantics = [#tpu.dimension_semantics<arbitrary>], iteration_bounds = array<i64: 1>, scalar_prefetch = 0 : i64, scratch_operands = 1 : i64, tpu.core_type = #tpu.core_type<tc>, window_params = [{pipeline_mode = #tpu.pipeline_mode<synchronous>, transform_indices = @transform_0, window_bounds = array<i64: 64, 16>}, {pipeline_mode = #tpu.pipeline_mode<synchronous>, transform_indices = @transform_1, window_bounds = array<i64: 16, 384>}, {pipeline_mode = #tpu.pipeline_mode<synchronous>, transform_indices = @transform_2, window_bounds = array<i64: 1, 384>}, {pipeline_mode = #tpu.pipeline_mode<synchronous>, transform_indices = @transform_3, window_bounds = array<i64: 128, 384>}, {pipeline_mode = #tpu.pipeline_mode<synchronous>, transform_indices = @transform_4, window_bounds = array<i64: 1, 128>}, {pipeline_mode = #tpu.pipeline_mode<synchronous>, transform_indices = @transform_5, window_bounds = array<i64: 128, 128>}, {pipeline_mode = #tpu.pipeline_mode<synchronous>, transform_indices = @transform_6, window_bounds = array<i64: 1, 128>}, {pipeline_mode = #tpu.pipeline_mode<synchronous>, transform_indices = @transform_7, window_bounds = array<i64: 8, 128>}]} {
    %c0 = arith.constant 0 : index
    %c0_0 = arith.constant 0 : index
    %0 = vector.load %arg1[%c0, %c0_0] : memref<64x16xbf16, #tpu.memory_space<vmem>>, vector<64x16xbf16>
    %c0_1 = arith.constant 0 : index
    %c0_2 = arith.constant 0 : index
    %1 = vector.load %arg2[%c0_1, %c0_2] : memref<16x384xbf16, #tpu.memory_space<vmem>>, vector<16x384xbf16>
    %cst = arith.constant dense<0.000000e+00> : vector<64x384xf32>
    %2 = tpu.matmul %0, %1, %cst {dimension_numbers = #tpu.dot_dimension_numbers<[1], [0], [0], [1], [0, 0, 1, 1], [], []>} : vector<64x16xbf16>, vector<16x384xbf16>, vector<64x384xf32> -> vector<64x384xf32>
    %c0_3 = arith.constant 0 : index
    %c0_4 = arith.constant 0 : index
    %3 = vector.load %arg3[%c0_3, %c0_4] : memref<1x384xf32, #tpu.memory_space<vmem>>, vector<1x384xf32>
    %4 = vector.broadcast %3 : vector<1x384xf32> to vector<64x384xf32>
    %5 = arith.addf %2, %4 : vector<64x384xf32>
    %c0_5 = arith.constant 0 : index
    %c0_6 = arith.constant 0 : index
    %6 = vector.load %arg9[%c0_5, %c0_6] : memref<64x384xf32, #tpu.memory_space<vmem>>, vector<64x384xf32>
    tpu.vector_store %arg9[%c0_5, %c0_6], %5 {strides = array<i32>} : memref<64x384xf32, #tpu.memory_space<vmem>>, vector<64x384xf32>,
    %c0_7 = arith.constant 0 : index
    %c0_8 = arith.constant 0 : index
    %7 = vector.load %arg5[%c0_7, %c0_8] : memref<1x128xf32, #tpu.memory_space<vmem>>, vector<1x128xf32>
    %8 = vector.shape_cast %7 : vector<1x128xf32> to vector<1x128xf32>
    %9 = vector.broadcast %8 : vector<1x128xf32> to vector<8x128xf32>
    %c0_9 = arith.constant 0 : index
    %c0_10 = arith.constant 0 : index
    %10 = vector.load %arg4[%c0_9, %c0_10] : memref<128x384xbf16, #tpu.memory_space<vmem>>, vector<128x384xbf16>
    %cst_11 = arith.constant 0.000000e+00 : f32
    %11 = vector.broadcast %cst_11 : f32 to vector<8x128xf32>
    %c0_i32 = arith.constant 0 : i32
    %c8_i32 = arith.constant 8 : i32
    %12 = arith.muli %c0_i32, %c8_i32 : i32
    %13 = tpu.assume_multiple %12, 8 : i32
    %14 = arith.index_cast %13 : i32 to index
    %c0_12 = arith.constant 0 : index
    %15 = vector.load %arg9[%14, %c0_12] : memref<64x384xf32, #tpu.memory_space<vmem>>, vector<8x384xf32>
    %16 = arith.truncf %11 : vector<8x128xf32> to vector<8x128xbf16>
    %cst_13 = arith.constant dense<0.000000e+00> : vector<8x384xf32>
    %17 = tpu.matmul %16, %10, %cst_13 {dimension_numbers = #tpu.dot_dimension_numbers<[1], [0], [0], [1], [0, 0, 1, 1], [], []>} : vector<8x128xbf16>, vector<128x384xbf16>, vector<8x384xf32> -> vector<8x384xf32>
    %18 = vector.extract_strided_slice %15 {offsets = [0, 0], sizes = [8, 256], strides = [1, 1]} : vector<8x384xf32> to vector<8x256xf32>
    %19 = vector.extract_strided_slice %17 {offsets = [0, 0], sizes = [8, 256], strides = [1, 1]} : vector<8x384xf32> to vector<8x256xf32>
    %20 = arith.addf %18, %19 : vector<8x256xf32>
    %21 = arith.negf %20 : vector<8x256xf32>
    %22 = math.exp %21 : vector<8x256xf32>
    %cst_14 = arith.constant 1.000000e+00 : f32
    %23 = vector.broadcast %cst_14 : f32 to vector<8x256xf32>
    %24 = arith.addf %23, %22 : vector<8x256xf32>
    %25 = arith.divf %23, %24 : vector<8x256xf32>
    %26 = vector.extract_strided_slice %25 {offsets = [0, 0], sizes = [8, 128], strides = [1, 1]} : vector<8x256xf32> to vector<8x128xf32>
    %27 = vector.extract_strided_slice %25 {offsets = [0, 128], sizes = [8, 128], strides = [1, 1]} : vector<8x256xf32> to vector<8x128xf32>
    %28 = vector.extract_strided_slice %15 {offsets = [0, 256], sizes = [8, 128], strides = [1, 1]} : vector<8x384xf32> to vector<8x128xf32>
    %29 = vector.extract_strided_slice %17 {offsets = [0, 256], sizes = [8, 128], strides = [1, 1]} : vector<8x384xf32> to vector<8x128xf32>
    %30 = arith.addf %29, %9 : vector<8x128xf32>
    %31 = arith.mulf %26, %30 : vector<8x128xf32>
    %32 = arith.addf %28, %31 : vector<8x128xf32>
    %33 = math.tanh %32 : vector<8x128xf32>
    %cst_15 = arith.constant 1.000000e+00 : f32
    %34 = vector.broadcast %cst_15 : f32 to vector<8x128xf32>
    %35 = arith.subf %34, %27 : vector<8x128xf32>
    %36 = arith.mulf %35, %33 : vector<8x128xf32>
    %37 = arith.mulf %27, %11 : vector<8x128xf32>
    %38 = arith.addf %36, %37 : vector<8x128xf32>
    %c1_i32 = arith.constant 1 : i32
    %c8_i32_16 = arith.constant 8 : i32
    %39 = arith.muli %c1_i32, %c8_i32_16 : i32
    %40 = tpu.assume_multiple %39, 8 : i32
    %41 = arith.index_cast %40 : i32 to index
    %c0_17 = arith.constant 0 : index
    %42 = vector.load %arg9[%41, %c0_17] : memref<64x384xf32, #tpu.memory_space<vmem>>, vector<8x384xf32>
    %43 = arith.truncf %38 : vector<8x128xf32> to vector<8x128xbf16>
    %cst_18 = arith.constant dense<0.000000e+00> : vector<8x384xf32>
    %44 = tpu.matmul %43, %10, %cst_18 {dimension_numbers = #tpu.dot_dimension_numbers<[1], [0], [0], [1], [0, 0, 1, 1], [], []>} : vector<8x128xbf16>, vector<128x384xbf16>, vector<8x384xf32> -> vector<8x384xf32>
    %45 = vector.extract_strided_slice %42 {offsets = [0, 0], sizes = [8, 256], strides = [1, 1]} : vector<8x384xf32> to vector<8x256xf32>
    %46 = vector.extract_strided_slice %44 {offsets = [0, 0], sizes = [8, 256], strides = [1, 1]} : vector<8x384xf32> to vector<8x256xf32>
    %47 = arith.addf %45, %46 : vector<8x256xf32>
    %48 = arith.negf %47 : vector<8x256xf32>
    %49 = math.exp %48 : vector<8x256xf32>
    %cst_19 = arith.constant 1.000000e+00 : f32
    %50 = vector.broadcast %cst_19 : f32 to vector<8x256xf32>
    %51 = arith.addf %50, %49 : vector<8x256xf32>
    %52 = arith.divf %50, %51 : vector<8x256xf32>
    %53 = vector.extract_strided_slice %52 {offsets = [0, 0], sizes = [8, 128], strides = [1, 1]} : vector<8x256xf32> to vector<8x128xf32>
    %54 = vector.extract_strided_slice %52 {offsets = [0, 128], sizes = [8, 128], strides = [1, 1]} : vector<8x256xf32> to vector<8x128xf32>
    %55 = vector.extract_strided_slice %42 {offsets = [0, 256], sizes = [8, 128], strides = [1, 1]} : vector<8x384xf32> to vector<8x128xf32>
    %56 = vector.extract_strided_slice %44 {offsets = [0, 256], sizes = [8, 128], strides = [1, 1]} : vector<8x384xf32> to vector<8x128xf32>
    %57 = arith.addf %56, %9 : vector<8x128xf32>
    %58 = arith.mulf %53, %57 : vector<8x128xf32>
    %59 = arith.addf %55, %58 : vector<8x128xf32>
    %60 = math.tanh %59 : vector<8x128xf32>
    %cst_20 = arith.constant 1.000000e+00 : f32
    %61 = vector.broadcast %cst_20 : f32 to vector<8x128xf32>
    %62 = arith.subf %61, %54 : vector<8x128xf32>
    %63 = arith.mulf %62, %60 : vector<8x128xf32>
    %64 = arith.mulf %54, %38 : vector<8x128xf32>
    %65 = arith.addf %63, %64 : vector<8x128xf32>
    %c2_i32 = arith.constant 2 : i32
    %c8_i32_21 = arith.constant 8 : i32
    %66 = arith.muli %c2_i32, %c8_i32_21 : i32
    %67 = tpu.assume_multiple %66, 8 : i32
    %68 = arith.index_cast %67 : i32 to index
    %c0_22 = arith.constant 0 : index
    %69 = vector.load %arg9[%68, %c0_22] : memref<64x384xf32, #tpu.memory_space<vmem>>, vector<8x384xf32>
    %70 = arith.truncf %65 : vector<8x128xf32> to vector<8x128xbf16>
    %cst_23 = arith.constant dense<0.000000e+00> : vector<8x384xf32>
    %71 = tpu.matmul %70, %10, %cst_23 {dimension_numbers = #tpu.dot_dimension_numbers<[1], [0], [0], [1], [0, 0, 1, 1], [], []>} : vector<8x128xbf16>, vector<128x384xbf16>, vector<8x384xf32> -> vector<8x384xf32>
    %72 = vector.extract_strided_slice %69 {offsets = [0, 0], sizes = [8, 256], strides = [1, 1]} : vector<8x384xf32> to vector<8x256xf32>
    %73 = vector.extract_strided_slice %71 {offsets = [0, 0], sizes = [8, 256], strides = [1, 1]} : vector<8x384xf32> to vector<8x256xf32>
    %74 = arith.addf %72, %73 : vector<8x256xf32>
    %75 = arith.negf %74 : vector<8x256xf32>
    %76 = math.exp %75 : vector<8x256xf32>
    %cst_24 = arith.constant 1.000000e+00 : f32
    %77 = vector.broadcast %cst_24 : f32 to vector<8x256xf32>
    %78 = arith.addf %77, %76 : vector<8x256xf32>
    %79 = arith.divf %77, %78 : vector<8x256xf32>
    %80 = vector.extract_strided_slice %79 {offsets = [0, 0], sizes = [8, 128], strides = [1, 1]} : vector<8x256xf32> to vector<8x128xf32>
    %81 = vector.extract_strided_slice %79 {offsets = [0, 128], sizes = [8, 128], strides = [1, 1]} : vector<8x256xf32> to vector<8x128xf32>
    %82 = vector.extract_strided_slice %69 {offsets = [0, 256], sizes = [8, 128], strides = [1, 1]} : vector<8x384xf32> to vector<8x128xf32>
    %83 = vector.extract_strided_slice %71 {offsets = [0, 256], sizes = [8, 128], strides = [1, 1]} : vector<8x384xf32> to vector<8x128xf32>
    %84 = arith.addf %83, %9 : vector<8x128xf32>
    %85 = arith.mulf %80, %84 : vector<8x128xf32>
    %86 = arith.addf %82, %85 : vector<8x128xf32>
    %87 = math.tanh %86 : vector<8x128xf32>
    %cst_25 = arith.constant 1.000000e+00 : f32
    %88 = vector.broadcast %cst_25 : f32 to vector<8x128xf32>
    %89 = arith.subf %88, %81 : vector<8x128xf32>
    %90 = arith.mulf %89, %87 : vector<8x128xf32>
    %91 = arith.mulf %81, %65 : vector<8x128xf32>
    %92 = arith.addf %90, %91 : vector<8x128xf32>
    %c3_i32 = arith.constant 3 : i32
    %c8_i32_26 = arith.constant 8 : i32
    %93 = arith.muli %c3_i32, %c8_i32_26 : i32
    %94 = tpu.assume_multiple %93, 8 : i32
    %95 = arith.index_cast %94 : i32 to index
    %c0_27 = arith.constant 0 : index
    %96 = vector.load %arg9[%95, %c0_27] : memref<64x384xf32, #tpu.memory_space<vmem>>, vector<8x384xf32>
    %97 = arith.truncf %92 : vector<8x128xf32> to vector<8x128xbf16>
    %cst_28 = arith.constant dense<0.000000e+00> : vector<8x384xf32>
    %98 = tpu.matmul %97, %10, %cst_28 {dimension_numbers = #tpu.dot_dimension_numbers<[1], [0], [0], [1], [0, 0, 1, 1], [], []>} : vector<8x128xbf16>, vector<128x384xbf16>, vector<8x384xf32> -> vector<8x384xf32>
    %99 = vector.extract_strided_slice %96 {offsets = [0, 0], sizes = [8, 256], strides = [1, 1]} : vector<8x384xf32> to vector<8x256xf32>
    %100 = vector.extract_strided_slice %98 {offsets = [0, 0], sizes = [8, 256], strides = [1, 1]} : vector<8x384xf32> to vector<8x256xf32>
    %101 = arith.addf %99, %100 : vector<8x256xf32>
    %102 = arith.negf %101 : vector<8x256xf32>
    %103 = math.exp %102 : vector<8x256xf32>
    %cst_29 = arith.constant 1.000000e+00 : f32
    %104 = vector.broadcast %cst_29 : f32 to vector<8x256xf32>
    %105 = arith.addf %104, %103 : vector<8x256xf32>
    %106 = arith.divf %104, %105 : vector<8x256xf32>
    %107 = vector.extract_strided_slice %106 {offsets = [0, 0], sizes = [8, 128], strides = [1, 1]} : vector<8x256xf32> to vector<8x128xf32>
    %108 = vector.extract_strided_slice %106 {offsets = [0, 128], sizes = [8, 128], strides = [1, 1]} : vector<8x256xf32> to vector<8x128xf32>
    %109 = vector.extract_strided_slice %96 {offsets = [0, 256], sizes = [8, 128], strides = [1, 1]} : vector<8x384xf32> to vector<8x128xf32>
    %110 = vector.extract_strided_slice %98 {offsets = [0, 256], sizes = [8, 128], strides = [1, 1]} : vector<8x384xf32> to vector<8x128xf32>
    %111 = arith.addf %110, %9 : vector<8x128xf32>
    %112 = arith.mulf %107, %111 : vector<8x128xf32>
    %113 = arith.addf %109, %112 : vector<8x128xf32>
    %114 = math.tanh %113 : vector<8x128xf32>
    %cst_30 = arith.constant 1.000000e+00 : f32
    %115 = vector.broadcast %cst_30 : f32 to vector<8x128xf32>
    %116 = arith.subf %115, %108 : vector<8x128xf32>
    %117 = arith.mulf %116, %114 : vector<8x128xf32>
    %118 = arith.mulf %108, %92 : vector<8x128xf32>
    %119 = arith.addf %117, %118 : vector<8x128xf32>
    %c4_i32 = arith.constant 4 : i32
    %c8_i32_31 = arith.constant 8 : i32
    %120 = arith.muli %c4_i32, %c8_i32_31 : i32
    %121 = tpu.assume_multiple %120, 8 : i32
    %122 = arith.index_cast %121 : i32 to index
    %c0_32 = arith.constant 0 : index
    %123 = vector.load %arg9[%122, %c0_32] : memref<64x384xf32, #tpu.memory_space<vmem>>, vector<8x384xf32>
    %124 = arith.truncf %119 : vector<8x128xf32> to vector<8x128xbf16>
    %cst_33 = arith.constant dense<0.000000e+00> : vector<8x384xf32>
    %125 = tpu.matmul %124, %10, %cst_33 {dimension_numbers = #tpu.dot_dimension_numbers<[1], [0], [0], [1], [0, 0, 1, 1], [], []>} : vector<8x128xbf16>, vector<128x384xbf16>, vector<8x384xf32> -> vector<8x384xf32>
    %126 = vector.extract_strided_slice %123 {offsets = [0, 0], sizes = [8, 256], strides = [1, 1]} : vector<8x384xf32> to vector<8x256xf32>
    %127 = vector.extract_strided_slice %125 {offsets = [0, 0], sizes = [8, 256], strides = [1, 1]} : vector<8x384xf32> to vector<8x256xf32>
    %128 = arith.addf %126, %127 : vector<8x256xf32>
    %129 = arith.negf %128 : vector<8x256xf32>
    %130 = math.exp %129 : vector<8x256xf32>
    %cst_34 = arith.constant 1.000000e+00 : f32
    %131 = vector.broadcast %cst_34 : f32 to vector<8x256xf32>
    %132 = arith.addf %131, %130 : vector<8x256xf32>
    %133 = arith.divf %131, %132 : vector<8x256xf32>
    %134 = vector.extract_strided_slice %133 {offsets = [0, 0], sizes = [8, 128], strides = [1, 1]} : vector<8x256xf32> to vector<8x128xf32>
    %135 = vector.extract_strided_slice %133 {offsets = [0, 128], sizes = [8, 128], strides = [1, 1]} : vector<8x256xf32> to vector<8x128xf32>
    %136 = vector.extract_strided_slice %123 {offsets = [0, 256], sizes = [8, 128], strides = [1, 1]} : vector<8x384xf32> to vector<8x128xf32>
    %137 = vector.extract_strided_slice %125 {offsets = [0, 256], sizes = [8, 128], strides = [1, 1]} : vector<8x384xf32> to vector<8x128xf32>
    %138 = arith.addf %137, %9 : vector<8x128xf32>
    %139 = arith.mulf %134, %138 : vector<8x128xf32>
    %140 = arith.addf %136, %139 : vector<8x128xf32>
    %141 = math.tanh %140 : vector<8x128xf32>
    %cst_35 = arith.constant 1.000000e+00 : f32
    %142 = vector.broadcast %cst_35 : f32 to vector<8x128xf32>
    %143 = arith.subf %142, %135 : vector<8x128xf32>
    %144 = arith.mulf %143, %141 : vector<8x128xf32>
    %145 = arith.mulf %135, %119 : vector<8x128xf32>
    %146 = arith.addf %144, %145 : vector<8x128xf32>
    %c5_i32 = arith.constant 5 : i32
    %c8_i32_36 = arith.constant 8 : i32
    %147 = arith.muli %c5_i32, %c8_i32_36 : i32
    %148 = tpu.assume_multiple %147, 8 : i32
    %149 = arith.index_cast %148 : i32 to index
    %c0_37 = arith.constant 0 : index
    %150 = vector.load %arg9[%149, %c0_37] : memref<64x384xf32, #tpu.memory_space<vmem>>, vector<8x384xf32>
    %151 = arith.truncf %146 : vector<8x128xf32> to vector<8x128xbf16>
    %cst_38 = arith.constant dense<0.000000e+00> : vector<8x384xf32>
    %152 = tpu.matmul %151, %10, %cst_38 {dimension_numbers = #tpu.dot_dimension_numbers<[1], [0], [0], [1], [0, 0, 1, 1], [], []>} : vector<8x128xbf16>, vector<128x384xbf16>, vector<8x384xf32> -> vector<8x384xf32>
    %153 = vector.extract_strided_slice %150 {offsets = [0, 0], sizes = [8, 256], strides = [1, 1]} : vector<8x384xf32> to vector<8x256xf32>
    %154 = vector.extract_strided_slice %152 {offsets = [0, 0], sizes = [8, 256], strides = [1, 1]} : vector<8x384xf32> to vector<8x256xf32>
    %155 = arith.addf %153, %154 : vector<8x256xf32>
    %156 = arith.negf %155 : vector<8x256xf32>
    %157 = math.exp %156 : vector<8x256xf32>
    %cst_39 = arith.constant 1.000000e+00 : f32
    %158 = vector.broadcast %cst_39 : f32 to vector<8x256xf32>
    %159 = arith.addf %158, %157 : vector<8x256xf32>
    %160 = arith.divf %158, %159 : vector<8x256xf32>
    %161 = vector.extract_strided_slice %160 {offsets = [0, 0], sizes = [8, 128], strides = [1, 1]} : vector<8x256xf32> to vector<8x128xf32>
    %162 = vector.extract_strided_slice %160 {offsets = [0, 128], sizes = [8, 128], strides = [1, 1]} : vector<8x256xf32> to vector<8x128xf32>
    %163 = vector.extract_strided_slice %150 {offsets = [0, 256], sizes = [8, 128], strides = [1, 1]} : vector<8x384xf32> to vector<8x128xf32>
    %164 = vector.extract_strided_slice %152 {offsets = [0, 256], sizes = [8, 128], strides = [1, 1]} : vector<8x384xf32> to vector<8x128xf32>
    %165 = arith.addf %164, %9 : vector<8x128xf32>
    %166 = arith.mulf %161, %165 : vector<8x128xf32>
    %167 = arith.addf %163, %166 : vector<8x128xf32>
    %168 = math.tanh %167 : vector<8x128xf32>
    %cst_40 = arith.constant 1.000000e+00 : f32
    %169 = vector.broadcast %cst_40 : f32 to vector<8x128xf32>
    %170 = arith.subf %169, %162 : vector<8x128xf32>
    %171 = arith.mulf %170, %168 : vector<8x128xf32>
    %172 = arith.mulf %162, %146 : vector<8x128xf32>
    %173 = arith.addf %171, %172 : vector<8x128xf32>
    %c6_i32 = arith.constant 6 : i32
    %c8_i32_41 = arith.constant 8 : i32
    %174 = arith.muli %c6_i32, %c8_i32_41 : i32
    %175 = tpu.assume_multiple %174, 8 : i32
    %176 = arith.index_cast %175 : i32 to index
    %c0_42 = arith.constant 0 : index
    %177 = vector.load %arg9[%176, %c0_42] : memref<64x384xf32, #tpu.memory_space<vmem>>, vector<8x384xf32>
    %178 = arith.truncf %173 : vector<8x128xf32> to vector<8x128xbf16>
    %cst_43 = arith.constant dense<0.000000e+00> : vector<8x384xf32>
    %179 = tpu.matmul %178, %10, %cst_43 {dimension_numbers = #tpu.dot_dimension_numbers<[1], [0], [0], [1], [0, 0, 1, 1], [], []>} : vector<8x128xbf16>, vector<128x384xbf16>, vector<8x384xf32> -> vector<8x384xf32>
    %180 = vector.extract_strided_slice %177 {offsets = [0, 0], sizes = [8, 256], strides = [1, 1]} : vector<8x384xf32> to vector<8x256xf32>
    %181 = vector.extract_strided_slice %179 {offsets = [0, 0], sizes = [8, 256], strides = [1, 1]} : vector<8x384xf32> to vector<8x256xf32>
    %182 = arith.addf %180, %181 : vector<8x256xf32>
    %183 = arith.negf %182 : vector<8x256xf32>
    %184 = math.exp %183 : vector<8x256xf32>
    %cst_44 = arith.constant 1.000000e+00 : f32
    %185 = vector.broadcast %cst_44 : f32 to vector<8x256xf32>
    %186 = arith.addf %185, %184 : vector<8x256xf32>
    %187 = arith.divf %185, %186 : vector<8x256xf32>
    %188 = vector.extract_strided_slice %187 {offsets = [0, 0], sizes = [8, 128], strides = [1, 1]} : vector<8x256xf32> to vector<8x128xf32>
    %189 = vector.extract_strided_slice %187 {offsets = [0, 128], sizes = [8, 128], strides = [1, 1]} : vector<8x256xf32> to vector<8x128xf32>
    %190 = vector.extract_strided_slice %177 {offsets = [0, 256], sizes = [8, 128], strides = [1, 1]} : vector<8x384xf32> to vector<8x128xf32>
    %191 = vector.extract_strided_slice %179 {offsets = [0, 256], sizes = [8, 128], strides = [1, 1]} : vector<8x384xf32> to vector<8x128xf32>
    %192 = arith.addf %191, %9 : vector<8x128xf32>
    %193 = arith.mulf %188, %192 : vector<8x128xf32>
    %194 = arith.addf %190, %193 : vector<8x128xf32>
    %195 = math.tanh %194 : vector<8x128xf32>
    %cst_45 = arith.constant 1.000000e+00 : f32
    %196 = vector.broadcast %cst_45 : f32 to vector<8x128xf32>
    %197 = arith.subf %196, %189 : vector<8x128xf32>
    %198 = arith.mulf %197, %195 : vector<8x128xf32>
    %199 = arith.mulf %189, %173 : vector<8x128xf32>
    %200 = arith.addf %198, %199 : vector<8x128xf32>
    %c7_i32 = arith.constant 7 : i32
    %c8_i32_46 = arith.constant 8 : i32
    %201 = arith.muli %c7_i32, %c8_i32_46 : i32
    %202 = tpu.assume_multiple %201, 8 : i32
    %203 = arith.index_cast %202 : i32 to index
    %c0_47 = arith.constant 0 : index
    %204 = vector.load %arg9[%203, %c0_47] : memref<64x384xf32, #tpu.memory_space<vmem>>, vector<8x384xf32>
    %205 = arith.truncf %200 : vector<8x128xf32> to vector<8x128xbf16>
    %cst_48 = arith.constant dense<0.000000e+00> : vector<8x384xf32>
    %206 = tpu.matmul %205, %10, %cst_48 {dimension_numbers = #tpu.dot_dimension_numbers<[1], [0], [0], [1], [0, 0, 1, 1], [], []>} : vector<8x128xbf16>, vector<128x384xbf16>, vector<8x384xf32> -> vector<8x384xf32>
    %207 = vector.extract_strided_slice %204 {offsets = [0, 0], sizes = [8, 256], strides = [1, 1]} : vector<8x384xf32> to vector<8x256xf32>
    %208 = vector.extract_strided_slice %206 {offsets = [0, 0], sizes = [8, 256], strides = [1, 1]} : vector<8x384xf32> to vector<8x256xf32>
    %209 = arith.addf %207, %208 : vector<8x256xf32>
    %210 = arith.negf %209 : vector<8x256xf32>
    %211 = math.exp %210 : vector<8x256xf32>
    %cst_49 = arith.constant 1.000000e+00 : f32
    %212 = vector.broadcast %cst_49 : f32 to vector<8x256xf32>
    %213 = arith.addf %212, %211 : vector<8x256xf32>
    %214 = arith.divf %212, %213 : vector<8x256xf32>
    %215 = vector.extract_strided_slice %214 {offsets = [0, 0], sizes = [8, 128], strides = [1, 1]} : vector<8x256xf32> to vector<8x128xf32>
    %216 = vector.extract_strided_slice %214 {offsets = [0, 128], sizes = [8, 128], strides = [1, 1]} : vector<8x256xf32> to vector<8x128xf32>
    %217 = vector.extract_strided_slice %204 {offsets = [0, 256], sizes = [8, 128], strides = [1, 1]} : vector<8x384xf32> to vector<8x128xf32>
    %218 = vector.extract_strided_slice %206 {offsets = [0, 256], sizes = [8, 128], strides = [1, 1]} : vector<8x384xf32> to vector<8x128xf32>
    %219 = arith.addf %218, %9 : vector<8x128xf32>
    %220 = arith.mulf %215, %219 : vector<8x128xf32>
    %221 = arith.addf %217, %220 : vector<8x128xf32>
    %222 = math.tanh %221 : vector<8x128xf32>
    %cst_50 = arith.constant 1.000000e+00 : f32
    %223 = vector.broadcast %cst_50 : f32 to vector<8x128xf32>
    %224 = arith.subf %223, %216 : vector<8x128xf32>
    %225 = arith.mulf %224, %222 : vector<8x128xf32>
    %226 = arith.mulf %216, %200 : vector<8x128xf32>
    %227 = arith.addf %225, %226 : vector<8x128xf32>
    %c8_i32_51 = arith.constant 8 : i32
    %228 = arith.truncf %227 : vector<8x128xf32> to vector<8x128xbf16>
    %c0_52 = arith.constant 0 : index
    %c0_53 = arith.constant 0 : index
    %229 = vector.load %arg6[%c0_52, %c0_53] : memref<128x128xbf16, #tpu.memory_space<vmem>>, vector<128x128xbf16>
    %cst_54 = arith.constant dense<0.000000e+00> : vector<8x128xf32>
    %230 = tpu.matmul %228, %229, %cst_54 {dimension_numbers = #tpu.dot_dimension_numbers<[1], [0], [0], [1], [0, 0, 1, 1], [], []>} : vector<8x128xbf16>, vector<128x128xbf16>, vector<8x128xf32> -> vector<8x128xf32>
    %c0_55 = arith.constant 0 : index
    %c0_56 = arith.constant 0 : index
    %231 = vector.load %arg7[%c0_55, %c0_56] : memref<1x128xf32, #tpu.memory_space<vmem>>, vector<1x128xf32>
    %232 = vector.broadcast %231 : vector<1x128xf32> to vector<8x128xf32>
    %233 = arith.addf %230, %232 : vector<8x128xf32>
    %c0_57 = arith.constant 0 : index
    %c0_58 = arith.constant 0 : index
    %234 = vector.load %arg8[%c0_57, %c0_58] : memref<8x128xf32, #tpu.memory_space<vmem>>, vector<8x128xf32>
    tpu.vector_store %arg8[%c0_57, %c0_58], %233 {strides = array<i32>} : memref<8x128xf32, #tpu.memory_space<vmem>>, vector<8x128xf32>,
    return
  }
  func.func @transform_0(%arg0: i32) -> (i32, i32) {
    %c0_i32 = arith.constant 0 : i32
    %c0_i32_0 = arith.constant 0 : i32
    %c0_i32_1 = arith.constant 0 : i32
    return %c0_i32, %c0_i32_0 : i32, i32
  }
  func.func @transform_1(%arg0: i32) -> (i32, i32) {
    %c0_i32 = arith.constant 0 : i32
    %c0_i32_0 = arith.constant 0 : i32
    %c0_i32_1 = arith.constant 0 : i32
    return %c0_i32, %c0_i32_0 : i32, i32
  }
  func.func @transform_2(%arg0: i32) -> (i32, i32) {
    %c0_i32 = arith.constant 0 : i32
    %c0_i32_0 = arith.constant 0 : i32
    %c0_i32_1 = arith.constant 0 : i32
    return %c0_i32, %c0_i32_0 : i32, i32
  }
  func.func @transform_3(%arg0: i32) -> (i32, i32) {
    %c0_i32 = arith.constant 0 : i32
    %c0_i32_0 = arith.constant 0 : i32
    %c0_i32_1 = arith.constant 0 : i32
    return %c0_i32, %c0_i32_0 : i32, i32
  }
  func.func @transform_4(%arg0: i32) -> (i32, i32) {
    %c0_i32 = arith.constant 0 : i32
    %c0_i32_0 = arith.constant 0 : i32
    %c0_i32_1 = arith.constant 0 : i32
    return %c0_i32, %c0_i32_0 : i32, i32
  }
  func.func @transform_5(%arg0: i32) -> (i32, i32) {
    %c0_i32 = arith.constant 0 : i32
    %c0_i32_0 = arith.constant 0 : i32
    %c0_i32_1 = arith.constant 0 : i32
    return %c0_i32, %c0_i32_0 : i32, i32
  }
  func.func @transform_6(%arg0: i32) -> (i32, i32) {
    %c0_i32 = arith.constant 0 : i32
    %c0_i32_0 = arith.constant 0 : i32
    %c0_i32_1 = arith.constant 0 : i32
    return %c0_i32, %c0_i32_0 : i32, i32
  }
  func.func @transform_7(%arg0: i32) -> (i32, i32) {
    %c0_i32 = arith.constant 0 : i32
    %c0_i32_0 = arith.constant 0 : i32
    %c0_i32_1 = arith.constant 0 : i32
    return %c0_i32, %c0_i32_0 : i32, i32
  }
}

</mosaic_0001>

<bundles_post_ra>
// kernel: tpu_custom_call.1
= control target key start
LH: loop header
LB: loop body
LE: loop exit
PB: predicated region body
PF: predicated region fallthrough
CT: control target
= control target key end

     0   :  { %12 = vsyncpa [#allocation4], 0  ;;  %s2628_s0 = inlined_call_operand.vmem [shape: bf16[64,16], index: 0, kind: input, shape index: {}]   ;;  %s2629_s1 = inlined_call_operand.vmem [shape: bf16[16,384], index: 1, kind: input, shape index: {}]   ;;  %s2630_s2 = inlined_call_operand.vmem [shape: f32[1,384], index: 2, kind: input, shape index: {}]   ;;  %s2631_s3 = inlined_call_operand.hbm [shape: bf16[128,384], index: 3, kind: input, shape index: {}]   ;;  %s2632_s4 = inlined_call_operand.vmem [shape: f32[1,128], index: 4, kind: input, shape index: {}]   ;;  %s2633_s5 = inlined_call_operand.hbm [shape: bf16[128,128], index: 5, kind: input, shape index: {}]   ;;  %s2634_s6 = inlined_call_operand.vmem [shape: f32[1,128], index: 6, kind: input, shape index: {}]   ;;  %s2635_s7 = inlined_call_operand.hbm [shape: f32[8,128], index: 7, kind: output, shape index: {}]  }
   0x1   :  { %13 = vsyncpa [#allocation7], 0 }
   0x2   :  { %14 = vsyncpa [#allocation5], 0  ;;  %s2049_s24 = smov [#allocation3]   ;;  %s1977_s28 = scalar_lea.hbm %s2631_s3, 3072 }
   0x3   :  { %s26_s25 = sshll.u32 %s2049_s24, 4  ;;  %p1978_p0 = scmp.ne.s32.totalorder %s2631_s3, %s1977_s28  ;;  %s27_s25 = int_to_ptr.vmem [resolvable:$true] %s26_s25 }
   0x4   :  { %p1981_p1 = scmp.lt.u32.totalorder %s1977_s28, %s2631_s3 }
   0x6   :  { %p1983_p2 = pnand %p1981_p1, %p1978_p0 }
   0x8   :  { %1986 = shalt.err (!%p1983_p2)
}
   0x9   :  { %s1987_s10 = scalar_lea.vmem %s27_s25, 3072  ;;  %p1992_p4 = scmp.lt.s32.totalorder %s27_s25, %s27_s25 }
   0xa   :  { %p1988_p3 = scmp.ne.s32.totalorder %s27_s25, %s1987_s10  ;;  %p1993_p5 = scmp.lt.s32.totalorder %s1987_s10, %s1987_s10 }
   0xc   :  { %p1994_p6 = por %p1993_p5, %p1992_p4 }
   0xe   :  { %p1995_p7 = pnand %p1994_p6, %p1988_p3 }
  0x10   :  { %1998 = shalt.err (!%p1995_p7)
}
  0x11   :  { %s2050_s11 = smov 192   ;;  %s2051_s12 = smov 12  }
  0x12   :  { %32 = dma.hbm_to_vmem [thread:$0]  %s2631_s3, 3072, %s27_s25, [#allocation4], %s2050_s11, %s2050_s11, %s2051_s12  }
  0x13   :  { %s2052_s15 = smov [#allocation6]   ;;  %s1999_s19 = scalar_lea.hbm %s2633_s5, 1024 }
  0x14   :  { %s40_s16 = sshll.u32 %s2052_s15, 4  ;;  %p2000_p8 = scmp.ne.s32.totalorder %s2633_s5, %s1999_s19  ;;  %s41_s16 = int_to_ptr.vmem [resolvable:$true] %s40_s16 }
  0x15   :  { %p2003_p9 = scmp.lt.u32.totalorder %s1999_s19, %s2633_s5 }
  0x17   :  { %p2005_p10 = pnand %p2003_p9, %p2000_p8 }
  0x19   :  { %2008 = shalt.err (!%p2005_p10)
}
  0x1a   :  { %s2009_s24 = scalar_lea.vmem %s41_s16, 1024  ;;  %p2014_p12 = scmp.lt.s32.totalorder %s41_s16, %s41_s16 }
  0x1b   :  { %p2010_p11 = scmp.ne.s32.totalorder %s41_s16, %s2009_s24  ;;  %p2015_p13 = scmp.lt.s32.totalorder %s2009_s24, %s2009_s24 }
  0x1d   :  { %p2016_p0 = por %p2015_p13, %p2014_p12 }
  0x1f   :  { %p2017_p1 = pnand %p2016_p0, %p2010_p11 }
  0x21   :  { %2020 = shalt.err (!%p2017_p1)
}
  0x22   :  { %s2053_s3 = smov 64   ;;  %s2054_s25 = smov 4  }
  0x23   :  { %46 = dma.hbm_to_vmem [thread:$0]  %s2633_s5, 1024, %s41_s16, [#allocation7], %s2053_s3, %s2053_s3, %s2054_s25  }
  0x24   :  { %2043 = dma.done.wait [#allocation4], 3072  }
  0x25   :  { %2044 = vsyncadd [#allocation4], 4294964224 }
  0x26   :  { %2045 = dma.done.wait [#allocation7], 1024  }
  0x27   :  { %2046 = vsyncadd [#allocation7], 4294966272  ;;  %v2636_v0 = vmov 0   ;;  %v1829_v1 = vld [vmem:[%s2629_s1 + $0x4] ss:$12 sps:$4 sm:$0xff]   ;;  %vm121_vm0 = vcmask 130048   ;;  %v70_v33 = vlaneseq }
  0x28   :  { %166 = vmatprep.mubr.bf16.mxu0 %v2636_v0  ;;  %v1831_v2 = vld [vmem:[%s2629_s1] ss:$12 sps:$4 sm:$0xff]   ;;  %134 = vmatprep.subr.bf16.mxu0 %v1829_v1  ;;  %v2133_v4 = vld [vmem:[#allocation3 + $0x4] ss:$12 sps:$4 sm:$0xff]   ;;  %v2135_v5 = vld [vmem:[#allocation3] ss:$12 sps:$4 sm:$0xff]  }
  0x29   :  { %v1832_v3 = vld [vmem:[%s2628_s0] sm:$0xff]   ;;  %135 = vmatpush1.bf16.msra.mxu0 %v1831_v2  ;;  %v2143_v7 = vld [vmem:[#allocation3 + $0x18] ss:$12 sps:$4 sm:$0xff]   ;;  %v2147_v8 = vld [vmem:[#allocation3 + $0x34] ss:$12 sps:$4 sm:$0xff]   ;;  %v2638_v16 = vmov 0.0  }
  0x2a   :  { %v2137_v6 = vld [vmem:[#allocation3 + $0x1c] ss:$12 sps:$4 sm:$0xff]   ;;  %1631 = vmatprep.mubr.msk.bf16.mxu1 %vm121_vm0, %v1832_v3  ;;  %469 = vmatprep.subr.bf16.mxu0 %v2133_v4  ;;  %v1839_v9 = vld [vmem:[%s2628_s0 + $0x8] sm:$0xff]   ;;  %v2159_v12 = vld [vmem:[#allocation3 + $0x4c] ss:$12 sps:$4 sm:$0xff]   ;;  %vm2057_vm1 = vmmov 0  }
  0x2b   :  { %v2152_v10 = vld [vmem:[#allocation3 + $0x30] ss:$12 sps:$4 sm:$0xff]   ;;  %v2162_v13 = vld [vmem:[#allocation3 + $0x48] ss:$12 sps:$4 sm:$0xff]   ;;  %v2177_v18 = vld [vmem:[#allocation3 + $0x20] ss:$12 sps:$4 sm:$0xff]  }
  0x2c   :  { %1485 = vmatmul.mubr.msk.bf16.vlgmr.msra.gmra.mrb[0].mxu0 %vm121_vm0, %v1832_v3  ;;  %v1850_v11 = vld [vmem:[%s2629_s1 + $0x8] ss:$12 sps:$4 sm:$0xff]   ;;  %v2173_v17 = vld [vmem:[#allocation3 + $0x8] ss:$12 sps:$4 sm:$0xff]   ;;  %v2181_v19 = vld [vmem:[#allocation3 + $0x60] ss:$12 sps:$4 sm:$0xff]  }
  0x2d   :  { %470 = vmatpush1.bf16.msra.mxu0 %v2135_v5  ;;  %176 = vmatprep.mubr.bf16.mxu0 %v2636_v0  ;;  %v1846_v14 = vld [vmem:[%s2628_s0 + $0x10] sm:$0xff]   ;;  %v2169_v15 = vld [vmem:[#allocation3 + $0x64] ss:$12 sps:$4 sm:$0xff]   ;;  %v2199_v24 = vld [vmem:[#allocation3 + $0x94] ss:$12 sps:$4 sm:$0xff]   ;;  %v71_v34 = vshrl.u32 %v70_v33, 7 }
  0x2e   :  { %471 = vmatprep.subr.bf16.mxu0 %v2137_v6  ;;  %1629 = vmatprep.subr.bf16.mxu1 %v1850_v11  ;;  %v2185_v20 = vld [vmem:[#allocation3 + $0x7c] ss:$12 sps:$4 sm:$0xff]   ;;  %v2187_v21 = vld [vmem:[#allocation3 + $0x78] ss:$12 sps:$4 sm:$0xff]   ;;  %v2226_v30 = vld [vmem:[#allocation3 + $0x80] ss:$12 sps:$4 sm:$0xff]  }
  0x2f   :  { %1630 = vmatpush3.bf16.msra.mxu1 %v1850_v11  ;;  %v2191_v22 = vld [vmem:[#allocation3 + $0x38] ss:$12 sps:$4 sm:$0xff]   ;;  %v2202_v25 = vld [vmem:[#allocation3 + $0x90] ss:$12 sps:$4 sm:$0xff]   ;;  %v2217_v28 = vld [vmem:[#allocation3 + $0x68] ss:$12 sps:$4 sm:$0xff]  }
  0x30   :  { %1639 = vmatprep.subr.bf16.mxu1 %v2638_v16  ;;  %v1854_v23 = vld [vmem:[%s2628_s0 + $0x18] sm:$0xff]   ;;  %v2204_v26 = vld [vmem:[#allocation3 + $0x50] ss:$12 sps:$4 sm:$0xff]   ;;  %v2207_v27 = vld [vmem:[#allocation3 + $0xac] ss:$12 sps:$4 sm:$0xff]   ;;  %v72_v35 = vsub.s32 0, %v71_v34 }
  0x31   :  { %472 = vmatpush1.bf16.msra.mxu0 %v2143_v7  ;;  %v2220_v29 = vld [vmem:[#allocation3 + $0xa8] ss:$12 sps:$4 sm:$0xff]   ;;  %v2233_v31 = vld [vmem:[#allocation3 + $0x98] ss:$12 sps:$4 sm:$0xff]   ;;  %v2240_v32 = vld [vmem:[#allocation3 + $0xb0] ss:$12 sps:$4 sm:$0xff]  }
  0x32   :  { %473 = vmatprep.subr.bf16.mxu0 %v2147_v8  ;;  %1632 = vmatmul.mubr.msk.bf16.vlgmr.msra.gmra.mrb[0].mxu1 %vm121_vm0, %v1839_v9  ;;  %v68_v36 = vld [vmem:[%s2630_s2] sm:$0x7]  ;;  %v76_v37 = vsub.s32 1, %v71_v34  ;;  %v80_v46 = vsub.s32 2, %v71_v34  ;;  %s2058_s20 = smov [#allocation8]  }
  0x33   :  { %1640 = vmatpush3.bf16.msra.mxu1 %v2173_v17  ;;  %1635 = vmatprep.mubr.msk.bf16.mxu1 %vm121_vm0, %v1846_v14  ;;  %v73_v39 = vrot.slane %v68_v36, %v72_v35  ;;  %s1461_s21 = sshll.u32 %s2058_s20, 4  ;;  %s1462_s21 = int_to_ptr.vmem [resolvable:$true] %s1461_s21 }
  0x34   :  { %1486 = vmatmul.mubr.msk.bf16.gmra.mrb[4].mxu0 %vm121_vm0, %v1839_v9  ;;  %1641 = vmatprep.subr.bf16.mxu1 %v2638_v16  ;;  %v77_v41 = vrot.slane %v68_v36, %v76_v37  ;;  %v2285_v48 = vrot.slane %v68_v36, %v80_v46  ;;  %s2021_s22 = scalar_lea.vmem %s1462_s21, 128  ;;  %p2026_p3 = scmp.lt.s32.totalorder %s1462_s21, %s1462_s21 }
  0x35   :  { %474 = vmatpush1.bf16.msra.mxu0 %v2152_v10  ;;  %186 = vmatprep.mubr.bf16.mxu0 %v2636_v0  ;;  %p2022_p2 = scmp.ne.s32.totalorder %s1462_s21, %s2021_s22  ;;  %p2027_p4 = scmp.lt.s32.totalorder %s2021_s22, %s2021_s22 }
  0x36   :  { %475 = vmatprep.subr.bf16.mxu0 %v2159_v12 }
  0x37   :  { %1642 = vmatpush3.bf16.msra.mxu1 %v2177_v18  ;;  %p2028_p5 = por %p2027_p4, %p2026_p3 }
  0x38   :  { %1643 = vmatprep.subr.bf16.mxu1 %v2638_v16 }
  0x39   :  { %476 = vmatpush1.bf16.msra.mxu0 %v2162_v13  ;;  %p2029_p6 = pnand %p2028_p5, %p2022_p2 }
  0x3a   :  { %477 = vmatprep.subr.bf16.mxu0 %v2169_v15  ;;  %1636 = vmatmul.mubr.msk.bf16.gmra.mrb[4].mxu1 %vm121_vm0, %v1854_v23 }
  0x3b   :  { %1644 = vmatpush3.bf16.msra.mxu1 %v2191_v22  ;;  %1655 = vmatprep.mubr.msk.bf16.mxu1 %vm2057_vm1, %v2638_v16 }
  0x3c   :  { %1487 = vmatmul.mubr.msk.bf16.gmra.mrb[8].mxu0 %vm121_vm0, %v1846_v14  ;;  %1645 = vmatprep.subr.bf16.mxu1 %v2638_v16 }
  0x3d   :  { %478 = vmatpush1.bf16.msra.mxu0 %v2181_v19  ;;  %196 = vmatprep.mubr.bf16.mxu0 %v2636_v0 }
  0x3e   :  { %479 = vmatprep.subr.bf16.mxu0 %v2185_v20 }
  0x3f   :  { %1646 = vmatpush3.bf16.msra.mxu1 %v2204_v26 }
  0x40   :  { %1647 = vmatprep.subr.bf16.mxu1 %v2638_v16 }
  0x41   :  { %480 = vmatpush1.bf16.msra.mxu0 %v2187_v21 }
  0x42   :  { %481 = vmatprep.subr.bf16.mxu0 %v2199_v24 }
  0x43   :  { %1648 = vmatpush3.bf16.msra.mxu1 %v2217_v28 }
  0x44   :  { %1488 = vmatmul.mubr.msk.bf16.gmra.mrb[12].mxu0 %vm121_vm0, %v1854_v23  ;;  %1649 = vmatprep.subr.bf16.mxu1 %v2638_v16 }
  0x45   :  { %482 = vmatpush1.bf16.msra.mxu0 %v2202_v25  ;;  %501 = vmatprep.mubr.bf16.mxu0 %v2636_v0 }
  0x46   :  { %483 = vmatprep.subr.bf16.mxu0 %v2207_v27 }
  0x47   :  { %1650 = vmatpush3.bf16.msra.mxu1 %v2226_v30 }
  0x48   :  { %1651 = vmatprep.subr.bf16.mxu1 %v2638_v16 }
  0x49   :  { %484 = vmatpush1.bf16.msra.mxu0 %v2220_v29 }
  0x4a   :  { %579 = vmatprep.subr.bf16.mxu0 %v2133_v4 }
  0x4b   :  { %1652 = vmatpush3.bf16.msra.mxu1 %v2233_v31 }
  0x4c   :  { %502 = vmatmul.mubr.bf16.vlgmr.msra.gmra.mrb[16].mxu0 %v2636_v0  ;;  %1653 = vmatprep.subr.bf16.mxu1 %v2638_v16 }
  0x4d   :  { %580 = vmatpush1.bf16.msra.mxu0 %v2135_v5  ;;  %611 = vmatprep.mubr.bf16.mxu0 %v2636_v0 }
  0x4e   :  { %581 = vmatprep.subr.bf16.mxu0 %v2137_v6 }
  0x4f   :  { %1654 = vmatpush3.bf16.msra.mxu1 %v2240_v32 }
  0x50   :  { %1659 = vmatprep.subr.bf16.mxu1 %v2638_v16 }
  0x51   :  { %582 = vmatpush1.bf16.msra.mxu0 %v2143_v7 }
  0x52   :  { %583 = vmatprep.subr.bf16.mxu0 %v2147_v8  ;;  %1656 = vmatmul.mubr.bf16.vlgmr.msra.gmra.mrb[8].mxu1 %v2636_v0 }
  0x53   :  { %1660 = vmatpush3.bf16.msra.mxu1 %v2173_v17  ;;  %1675 = vmatprep.mubr.msk.bf16.mxu1 %vm2057_vm1, %v2638_v16 }
  0x54   :  { %1661 = vmatprep.subr.bf16.mxu1 %v2638_v16 }
  0x55   :  { %584 = vmatpush1.bf16.msra.mxu0 %v2152_v10 }
  0x56   :  { %585 = vmatprep.subr.bf16.mxu0 %v2159_v12 }
  0x57   :  { %1662 = vmatpush3.bf16.msra.mxu1 %v2177_v18 }
  0x58   :  { %1663 = vmatprep.subr.bf16.mxu1 %v2638_v16 }
  0x59   :  { %586 = vmatpush1.bf16.msra.mxu0 %v2162_v13 }
  0x5a   :  { %587 = vmatprep.subr.bf16.mxu0 %v2169_v15 }
  0x5b   :  { %1664 = vmatpush3.bf16.msra.mxu1 %v2191_v22 }
  0x5c   :  { %1665 = vmatprep.subr.bf16.mxu1 %v2638_v16 }
  0x5d   :  { %588 = vmatpush1.bf16.msra.mxu0 %v2181_v19 }
  0x5e   :  { %589 = vmatprep.subr.bf16.mxu0 %v2185_v20 }
  0x5f   :  { %1666 = vmatpush3.bf16.msra.mxu1 %v2204_v26 }
  0x60   :  { %1667 = vmatprep.subr.bf16.mxu1 %v2638_v16 }
  0x61   :  { %590 = vmatpush1.bf16.msra.mxu0 %v2187_v21 }
  0x62   :  { %591 = vmatprep.subr.bf16.mxu0 %v2199_v24 }
  0x63   :  { %1668 = vmatpush3.bf16.msra.mxu1 %v2217_v28 }
  0x64   :  { %1669 = vmatprep.subr.bf16.mxu1 %v2638_v16 }
  0x65   :  { %592 = vmatpush1.bf16.msra.mxu0 %v2202_v25 }
  0x66   :  { %593 = vmatprep.subr.bf16.mxu0 %v2207_v27 }
  0x67   :  { %1670 = vmatpush3.bf16.msra.mxu1 %v2226_v30 }
  0x68   :  { %1671 = vmatprep.subr.bf16.mxu1 %v2638_v16 }
  0x69   :  { %594 = vmatpush1.bf16.msra.mxu0 %v2220_v29 }
  0x6a   :  { %689 = vmatprep.subr.bf16.mxu0 %v2133_v4 }
  0x6b   :  { %1672 = vmatpush3.bf16.msra.mxu1 %v2233_v31 }
  0x6c   :  { %1673 = vmatprep.subr.bf16.mxu1 %v2638_v16 }
  0x6f   :  { %1674 = vmatpush3.bf16.msra.mxu1 %v2240_v32 }
  0x70   :  { %1679 = vmatprep.subr.bf16.mxu1 %v2638_v16 }
  0xff   :  { %v168_v38 = vpop.f32.mrb[0].mxu0 }
 0x100   :  { %v170_v40 = vpop.f32.mrb[1].mxu0 }
 0x101   :  { %v172_v42 = vpop.f32.mrb[2].mxu0 }
 0x102   :  { %v2281_v43 = vadd.f32 %v172_v42, %v73_v39  ;;  %v174_v44 = vpop.f32.mrb[3].mxu0 }
 0x103   :  { %v2283_v45 = vadd.f32 %v174_v44, %v77_v41 }
 0x105   :  { %v1633_v55 = vpop.f32.mrb[0].mxu1 }
 0x106   :  { %v2296_v57 = vadd.f32 %v1633_v55, %v2285_v48  ;;  %v241_v58 = vpop.f32.mrb[1].mxu1 }
 0x107   :  { %v178_v47 = vpop.f32.mrb[4].mxu0  ;;  %v1634_v59 = vpop.f32.mrb[2].mxu1 }
 0x108   :  { %v2287_v49 = vadd.f32 %v178_v47, %v73_v39  ;;  %v180_v50 = vpop.f32.mrb[5].mxu0  ;;  %v2299_v60 = vadd.f32 %v1634_v59, %v2285_v48  ;;  %v244_v61 = vpop.f32.mrb[3].mxu1 }
 0x109   :  { %v2289_v51 = vadd.f32 %v180_v50, %v77_v41  ;;  %v182_v52 = vpop.f32.mrb[6].mxu0  ;;  %v2302_v62 = vadd.f32 %v244_v61, %v2285_v48 }
 0x10a   :  { %v2291_v53 = vadd.f32 %v182_v52, %v73_v39  ;;  %v184_v54 = vpop.f32.mrb[7].mxu0 }
 0x10b   :  { %v2293_v56 = vadd.f32 %v184_v54, %v77_v41 }
 0x10d   :  { %v1637_v23 = vpop.f32.mrb[4].mxu1 }
 0x10e   :  { %v2313_v34 = vadd.f32 %v1637_v23, %v2285_v48  ;;  %v257_v35 = vpop.f32.mrb[5].mxu1 }
 0x10f   :  { %v188_v63 = vpop.f32.mrb[8].mxu0  ;;  %v2316_v36 = vadd.f32 %v257_v35, %v2285_v48  ;;  %v1638_v37 = vpop.f32.mrb[6].mxu1 }
 0x110   :  { %v2304_v1 = vadd.f32 %v188_v63, %v73_v39  ;;  %v190_v2 = vpop.f32.mrb[9].mxu0  ;;  %2640 = vst [vmem:[#allocation12_spill] sm:$0xff] %v2313_v34  ;;  %v2319_v42 = vadd.f32 %v1638_v37, %v2285_v48  ;;  %v260_v44 = vpop.f32.mrb[7].mxu1 }
 0x111   :  { %v2306_v3 = vadd.f32 %v190_v2, %v77_v41  ;;  %v192_v9 = vpop.f32.mrb[10].mxu0  ;;  %v2322_v46 = vadd.f32 %v260_v44, %v2285_v48  ;;  %v169_v2 = vadd.f32 %v168_v38, %v73_v39  ;;  %v2335_v38 = vld [vmem:[%s2632_s4] ss:$0 sm:$0xff] }
 0x112   :  { %v2308_v11 = vadd.f32 %v192_v9, %v73_v39  ;;  %v194_v14 = vpop.f32.mrb[11].mxu0  ;;  %2641 = vst [vmem:[#allocation13_spill] sm:$0xff] %v2319_v42  ;;  %v171_v9 = vadd.f32 %v170_v40, %v77_v41 }
 0x113   :  { %v2310_v33 = vadd.f32 %v194_v14, %v77_v41 }
 0x117   :  { %v198_v47 = vpop.f32.mrb[12].mxu0 }
 0x118   :  { %v2324_v50 = vadd.f32 %v198_v47, %v73_v39  ;;  %v200_v52 = vpop.f32.mrb[13].mxu0 }
 0x119   :  { %v2326_v54 = vadd.f32 %v200_v52, %v77_v41  ;;  %v202_v55 = vpop.f32.mrb[14].mxu0 }
 0x11a   :  { %v2328_v59 = vadd.f32 %v202_v55, %v73_v39  ;;  %v204_v61 = vpop.f32.mrb[15].mxu0 }
 0x11b   :  { %2642 = vst [vmem:[#allocation14_spill] sm:$0xff] %v2326_v54  ;;  %v2330_v63 = vadd.f32 %v204_v61, %v77_v41 }
 0x11c   :  { %2643 = vst [vmem:[#allocation15_spill] sm:$0xff] %v2328_v59 }
 0x11f   :  { %v503_v14 = vpop.f32.mrb[16].mxu0 }
 0x120   :  { %v550_v23 = vadd.f32 %v503_v14, %v169_v2  ;;  %v505_v35 = vpop.f32.mrb[17].mxu0 }
 0x121   :  { %v551_v37 = vadd.f32 %v505_v35, %v171_v9  ;;  %v507_v44 = vpop.f32.mrb[18].mxu0 }
 0x122   :  { %v1518_v0 = vmul.f32 -1.442695, %v550_v23  ;;  %v508_v16 = vpop.f32.mrb[19].mxu0 }
 0x123   :  { %v1519_v47 = vmul.f32 -1.442695, %v551_v37 }
 0x124   :  { %1877 = vpow2.f32 %v1518_v0  ;;  %v242_v0 = vadd.f32 %v241_v58, %v2285_v48  ;;  %v2644_v48 = vmov 0.0   ;;  %v2645_v58 = vmov 0  }
 0x125   :  { %v544_v42 = vpop.f32.mrb[8].mxu1  ;;  %1879 = vpow2.f32 %v1519_v47 }
 0x126   :  { %v1657_v52 = vpop.f32.mrb[9].mxu1  ;;  %v564_v40 = vadd.f32 %v2335_v38, %v544_v42 }
 0x127   :  { %v547_v34 = vpop.f32.mrb[10].mxu1 }
 0x128   :  { %v1658_v55 = vpop.f32.mrb[11].mxu1 }
 0x12e   :  { %v1878_v59 = vpop.eup %1877 }
 0x12f   :  { %v558_v54 = vadd.f32 1.0, %v1878_v59  ;;  %v1880_v61 = vpop.eup %1879 }
 0x130   :  { %v559_v39 = vadd.f32 1.0, %v1880_v61 }
 0x131   :  { %1881 = vrcp.f32 %v558_v54 }
 0x132   :  { %1883 = vrcp.f32 %v559_v39 }
 0x13b   :  { %v1882_v16 = vpop.eup %1881 }
 0x13c   :  { %v565_v41 = vmul.f32 %v1882_v16, %v564_v40  ;;  %v1884_v34 = vpop.eup %1883 }
 0x13d   :  { %v568_v9 = vsub.f32 1.0, %v1884_v34  ;;  %v570_v14 = vmul.f32 0.0, %v1884_v34 }
 0x13e   :  { %v566_v2 = vadd.f32 %v565_v41, %v242_v0 }
 0x140   :  { %1885 = vtanh.f32 %v566_v2 }
 0x14a   :  { %v1886_v59 = vpop.eup %1885 }
 0x14b   :  { %v569_v54 = vmul.f32 %v1886_v59, %v568_v9 }
 0x14d   :  { %v2339_v23 = vadd.f32 %v570_v14, %v569_v54 }
 0x14f   :  { %v578_v35 = vpack.c.bf16 %v2339_v23, %v2339_v23 }
 0x151   :  { %612 = vmatmul.mubr.bf16.vlgmr.msra.gmra.mrb[20].mxu0 %v578_v35  ;;  %1676 = vmatmul.mubr.bf16.vlgmr.msra.gmra.mrb[12].mxu1 %v578_v35 }
 0x152   :  { %690 = vmatpush1.bf16.msra.mxu0 %v2135_v5  ;;  %1680 = vmatpush3.bf16.msra.mxu1 %v2173_v17 }
 0x153   :  { %691 = vmatprep.subr.bf16.mxu0 %v2137_v6  ;;  %1681 = vmatprep.subr.bf16.mxu1 %v2644_v48 }
 0x154   :  { %721 = vmatprep.mubr.bf16.mxu0 %v2645_v58  ;;  %1695 = vmatprep.mubr.msk.bf16.mxu1 %vm2057_vm1, %v2644_v48 }
 0x156   :  { %692 = vmatpush1.bf16.msra.mxu0 %v2143_v7  ;;  %1682 = vmatpush3.bf16.msra.mxu1 %v2177_v18 }
 0x157   :  { %693 = vmatprep.subr.bf16.mxu0 %v2147_v8  ;;  %1683 = vmatprep.subr.bf16.mxu1 %v2644_v48 }
 0x15a   :  { %694 = vmatpush1.bf16.msra.mxu0 %v2152_v10  ;;  %1684 = vmatpush3.bf16.msra.mxu1 %v2191_v22 }
 0x15b   :  { %695 = vmatprep.subr.bf16.mxu0 %v2159_v12  ;;  %1685 = vmatprep.subr.bf16.mxu1 %v2644_v48 }
 0x15e   :  { %696 = vmatpush1.bf16.msra.mxu0 %v2162_v13  ;;  %1686 = vmatpush3.bf16.msra.mxu1 %v2204_v26 }
 0x15f   :  { %697 = vmatprep.subr.bf16.mxu0 %v2169_v15  ;;  %1687 = vmatprep.subr.bf16.mxu1 %v2644_v48 }
 0x162   :  { %698 = vmatpush1.bf16.msra.mxu0 %v2181_v19  ;;  %1688 = vmatpush3.bf16.msra.mxu1 %v2217_v28 }
 0x163   :  { %699 = vmatprep.subr.bf16.mxu0 %v2185_v20  ;;  %1689 = vmatprep.subr.bf16.mxu1 %v2644_v48 }
 0x166   :  { %700 = vmatpush1.bf16.msra.mxu0 %v2187_v21  ;;  %1690 = vmatpush3.bf16.msra.mxu1 %v2226_v30 }
 0x167   :  { %701 = vmatprep.subr.bf16.mxu0 %v2199_v24  ;;  %1691 = vmatprep.subr.bf16.mxu1 %v2644_v48 }
 0x16a   :  { %702 = vmatpush1.bf16.msra.mxu0 %v2202_v25  ;;  %1692 = vmatpush3.bf16.msra.mxu1 %v2233_v31 }
 0x16b   :  { %703 = vmatprep.subr.bf16.mxu0 %v2207_v27  ;;  %1693 = vmatprep.subr.bf16.mxu1 %v2644_v48 }
 0x16e   :  { %704 = vmatpush1.bf16.msra.mxu0 %v2220_v29  ;;  %1694 = vmatpush3.bf16.msra.mxu1 %v2240_v32 }
 0x16f   :  { %799 = vmatprep.subr.bf16.mxu0 %v2133_v4  ;;  %1699 = vmatprep.subr.bf16.mxu1 %v2644_v48 }
 0x224   :  { %v613_v42 = vpop.f32.mrb[20].mxu0  ;;  %v654_v37 = vpop.f32.mrb[12].mxu1 }
 0x225   :  { %v660_v44 = vadd.f32 %v613_v42, %v2281_v43  ;;  %v615_v47 = vpop.f32.mrb[21].mxu0  ;;  %v1677_v52 = vpop.f32.mrb[13].mxu1  ;;  %v674_v54 = vadd.f32 %v2335_v38, %v654_v37 }
 0x226   :  { %v661_v55 = vadd.f32 %v615_v47, %v2283_v45  ;;  %v617_v61 = vpop.f32.mrb[22].mxu0  ;;  %v657_v39 = vpop.f32.mrb[14].mxu1 }
 0x227   :  { %v1520_v40 = vmul.f32 -1.442695, %v660_v44  ;;  %v618_v16 = vpop.f32.mrb[23].mxu0  ;;  %v1678_v0 = vpop.f32.mrb[15].mxu1 }
 0x228   :  { %v1521_v41 = vmul.f32 -1.442695, %v661_v55 }
 0x229   :  { %1887 = vpow2.f32 %v1520_v40 }
 0x22a   :  { %1889 = vpow2.f32 %v1521_v41 }
 0x233   :  { %v1888_v2 = vpop.eup %1887 }
 0x234   :  { %v668_v34 = vadd.f32 1.0, %v1888_v2  ;;  %v1890_v9 = vpop.eup %1889 }
 0x235   :  { %v669_v59 = vadd.f32 1.0, %v1890_v9 }
 0x236   :  { %1891 = vrcp.f32 %v668_v34 }
 0x237   :  { %1893 = vrcp.f32 %v669_v59 }
 0x240   :  { %v1892_v43 = vpop.eup %1891 }
 0x241   :  { %v675_v14 = vmul.f32 %v1892_v43, %v674_v54  ;;  %v1894_v35 = vpop.eup %1893 }
 0x242   :  { %v678_v42 = vsub.f32 1.0, %v1894_v35  ;;  %v680_v52 = vmul.f32 %v1894_v35, %v2339_v23 }
 0x243   :  { %v676_v45 = vadd.f32 %v675_v14, %v2302_v62 }
 0x245   :  { %1895 = vtanh.f32 %v676_v45 }
 0x24f   :  { %v1896_v44 = vpop.eup %1895 }
 0x250   :  { %v679_v47 = vmul.f32 %v1896_v44, %v678_v42 }
 0x252   :  { %v2383_v55 = vadd.f32 %v680_v52, %v679_v47 }
 0x254   :  { %v688_v61 = vpack.c.bf16 %v2383_v55, %v2383_v55 }
 0x256   :  { %722 = vmatmul.mubr.bf16.vlgmr.msra.gmra.mrb[24].mxu0 %v688_v61  ;;  %1696 = vmatmul.mubr.bf16.vlgmr.msra.gmra.mrb[16].mxu1 %v688_v61 }
 0x257   :  { %800 = vmatpush1.bf16.msra.mxu0 %v2135_v5  ;;  %1700 = vmatpush3.bf16.msra.mxu1 %v2173_v17 }
 0x258   :  { %801 = vmatprep.subr.bf16.mxu0 %v2137_v6  ;;  %1701 = vmatprep.subr.bf16.mxu1 %v2644_v48 }
 0x259   :  { %831 = vmatprep.mubr.bf16.mxu0 %v2645_v58  ;;  %1715 = vmatprep.mubr.msk.bf16.mxu1 %vm2057_vm1, %v2644_v48 }
 0x25b   :  { %802 = vmatpush1.bf16.msra.mxu0 %v2143_v7  ;;  %1702 = vmatpush3.bf16.msra.mxu1 %v2177_v18 }
 0x25c   :  { %803 = vmatprep.subr.bf16.mxu0 %v2147_v8  ;;  %1703 = vmatprep.subr.bf16.mxu1 %v2644_v48 }
 0x25f   :  { %804 = vmatpush1.bf16.msra.mxu0 %v2152_v10  ;;  %1704 = vmatpush3.bf16.msra.mxu1 %v2191_v22 }
 0x260   :  { %805 = vmatprep.subr.bf16.mxu0 %v2159_v12  ;;  %1705 = vmatprep.subr.bf16.mxu1 %v2644_v48 }
 0x263   :  { %806 = vmatpush1.bf16.msra.mxu0 %v2162_v13  ;;  %1706 = vmatpush3.bf16.msra.mxu1 %v2204_v26 }
 0x264   :  { %807 = vmatprep.subr.bf16.mxu0 %v2169_v15  ;;  %1707 = vmatprep.subr.bf16.mxu1 %v2644_v48 }
 0x267   :  { %808 = vmatpush1.bf16.msra.mxu0 %v2181_v19  ;;  %1708 = vmatpush3.bf16.msra.mxu1 %v2217_v28 }
 0x268   :  { %809 = vmatprep.subr.bf16.mxu0 %v2185_v20  ;;  %1709 = vmatprep.subr.bf16.mxu1 %v2644_v48 }
 0x26b   :  { %810 = vmatpush1.bf16.msra.mxu0 %v2187_v21  ;;  %1710 = vmatpush3.bf16.msra.mxu1 %v2226_v30 }
 0x26c   :  { %811 = vmatprep.subr.bf16.mxu0 %v2199_v24  ;;  %1711 = vmatprep.subr.bf16.mxu1 %v2644_v48 }
 0x26f   :  { %812 = vmatpush1.bf16.msra.mxu0 %v2202_v25  ;;  %1712 = vmatpush3.bf16.msra.mxu1 %v2233_v31 }
 0x270   :  { %813 = vmatprep.subr.bf16.mxu0 %v2207_v27  ;;  %1713 = vmatprep.subr.bf16.mxu1 %v2644_v48 }
 0x273   :  { %814 = vmatpush1.bf16.msra.mxu0 %v2220_v29  ;;  %1714 = vmatpush3.bf16.msra.mxu1 %v2240_v32 }
 0x274   :  { %909 = vmatprep.subr.bf16.mxu0 %v2133_v4  ;;  %1719 = vmatprep.subr.bf16.mxu1 %v2644_v48 }
 0x329   :  { %v723_v62 = vpop.f32.mrb[24].mxu0  ;;  %v764_v23 = vpop.f32.mrb[16].mxu1 }
 0x32a   :  { %v770_v37 = vadd.f32 %v723_v62, %v2287_v49  ;;  %v725_v39 = vpop.f32.mrb[25].mxu0  ;;  %v1697_v40 = vpop.f32.mrb[17].mxu1  ;;  %v784_v35 = vadd.f32 %v2335_v38, %v764_v23 }
 0x32b   :  { %v771_v16 = vadd.f32 %v725_v39, %v2289_v51  ;;  %v727_v0 = vpop.f32.mrb[26].mxu0  ;;  %v767_v41 = vpop.f32.mrb[18].mxu1 }
 0x32c   :  { %v1522_v2 = vmul.f32 -1.442695, %v770_v37  ;;  %v728_v34 = vpop.f32.mrb[27].mxu0  ;;  %v1698_v9 = vpop.f32.mrb[19].mxu1 }
 0x32d   :  { %v1523_v59 = vmul.f32 -1.442695, %v771_v16 }
 0x32e   :  { %1897 = vpow2.f32 %v1522_v2 }
 0x32f   :  { %1899 = vpow2.f32 %v1523_v59 }
 0x338   :  { %v1898_v54 = vpop.eup %1897 }
 0x339   :  { %v778_v43 = vadd.f32 1.0, %v1898_v54  ;;  %v1900_v14 = vpop.eup %1899 }
 0x33a   :  { %v779_v45 = vadd.f32 1.0, %v1900_v14 }
 0x33b   :  { %1901 = vrcp.f32 %v778_v43 }
 0x33c   :  { %1903 = vrcp.f32 %v779_v45 }
 0x345   :  { %v1902_v49 = vpop.eup %1901 }
 0x346   :  { %v785_v42 = vmul.f32 %v1902_v49, %v784_v35  ;;  %v1904_v44 = vpop.eup %1903 }
 0x347   :  { %v788_v47 = vsub.f32 1.0, %v1904_v44  ;;  %v790_v62 = vmul.f32 %v1904_v44, %v2383_v55 }
 0x348   :  { %v786_v51 = vadd.f32 %v785_v42, %v2296_v57 }
 0x34a   :  { %1905 = vtanh.f32 %v786_v51 }
 0x354   :  { %v1906_v52 = vpop.eup %1905 }
 0x355   :  { %v789_v61 = vmul.f32 %v1906_v52, %v788_v47 }
 0x357   :  { %v2427_v37 = vadd.f32 %v790_v62, %v789_v61 }
 0x359   :  { %v798_v39 = vpack.c.bf16 %v2427_v37, %v2427_v37 }
 0x35b   :  { %832 = vmatmul.mubr.bf16.vlgmr.msra.gmra.mrb[28].mxu0 %v798_v39  ;;  %1716 = vmatmul.mubr.bf16.vlgmr.msra.gmra.mrb[20].mxu1 %v798_v39 }
 0x35c   :  { %910 = vmatpush1.bf16.msra.mxu0 %v2135_v5  ;;  %1720 = vmatpush3.bf16.msra.mxu1 %v2173_v17 }
 0x35d   :  { %911 = vmatprep.subr.bf16.mxu0 %v2137_v6  ;;  %1721 = vmatprep.subr.bf16.mxu1 %v2644_v48 }
 0x35e   :  { %941 = vmatprep.mubr.bf16.mxu0 %v2645_v58  ;;  %1735 = vmatprep.mubr.msk.bf16.mxu1 %vm2057_vm1, %v2644_v48 }
 0x360   :  { %912 = vmatpush1.bf16.msra.mxu0 %v2143_v7  ;;  %1722 = vmatpush3.bf16.msra.mxu1 %v2177_v18 }
 0x361   :  { %913 = vmatprep.subr.bf16.mxu0 %v2147_v8  ;;  %1723 = vmatprep.subr.bf16.mxu1 %v2644_v48 }
 0x364   :  { %914 = vmatpush1.bf16.msra.mxu0 %v2152_v10  ;;  %1724 = vmatpush3.bf16.msra.mxu1 %v2191_v22 }
 0x365   :  { %915 = vmatprep.subr.bf16.mxu0 %v2159_v12  ;;  %1725 = vmatprep.subr.bf16.mxu1 %v2644_v48 }
 0x368   :  { %916 = vmatpush1.bf16.msra.mxu0 %v2162_v13  ;;  %1726 = vmatpush3.bf16.msra.mxu1 %v2204_v26 }
 0x369   :  { %917 = vmatprep.subr.bf16.mxu0 %v2169_v15  ;;  %1727 = vmatprep.subr.bf16.mxu1 %v2644_v48 }
 0x36c   :  { %918 = vmatpush1.bf16.msra.mxu0 %v2181_v19  ;;  %1728 = vmatpush3.bf16.msra.mxu1 %v2217_v28 }
 0x36d   :  { %919 = vmatprep.subr.bf16.mxu0 %v2185_v20  ;;  %1729 = vmatprep.subr.bf16.mxu1 %v2644_v48 }
 0x370   :  { %920 = vmatpush1.bf16.msra.mxu0 %v2187_v21  ;;  %1730 = vmatpush3.bf16.msra.mxu1 %v2226_v30 }
 0x371   :  { %921 = vmatprep.subr.bf16.mxu0 %v2199_v24  ;;  %1731 = vmatprep.subr.bf16.mxu1 %v2644_v48 }
 0x374   :  { %922 = vmatpush1.bf16.msra.mxu0 %v2202_v25  ;;  %1732 = vmatpush3.bf16.msra.mxu1 %v2233_v31 }
 0x375   :  { %923 = vmatprep.subr.bf16.mxu0 %v2207_v27  ;;  %1733 = vmatprep.subr.bf16.mxu1 %v2644_v48 }
 0x378   :  { %924 = vmatpush1.bf16.msra.mxu0 %v2220_v29  ;;  %1734 = vmatpush3.bf16.msra.mxu1 %v2240_v32 }
 0x379   :  { %1019 = vmatprep.subr.bf16.mxu0 %v2133_v4  ;;  %1739 = vmatprep.subr.bf16.mxu1 %v2644_v48 }
 0x42e   :  { %v833_v57 = vpop.f32.mrb[28].mxu0  ;;  %v874_v55 = vpop.f32.mrb[20].mxu1 }
 0x42f   :  { %v880_v23 = vadd.f32 %v833_v57, %v2291_v53  ;;  %v835_v40 = vpop.f32.mrb[29].mxu0  ;;  %v1717_v16 = vpop.f32.mrb[21].mxu1  ;;  %v894_v49 = vadd.f32 %v2335_v38, %v874_v55 }
 0x430   :  { %v881_v0 = vadd.f32 %v835_v40, %v2293_v56  ;;  %v837_v41 = vpop.f32.mrb[30].mxu0  ;;  %v877_v2 = vpop.f32.mrb[22].mxu1 }
 0x431   :  { %v1524_v34 = vmul.f32 -1.442695, %v880_v23  ;;  %v838_v9 = vpop.f32.mrb[31].mxu0  ;;  %v1718_v59 = vpop.f32.mrb[23].mxu1 }
 0x432   :  { %v1525_v54 = vmul.f32 -1.442695, %v881_v0 }
 0x433   :  { %1907 = vpow2.f32 %v1524_v34 }
 0x434   :  { %1909 = vpow2.f32 %v1525_v54 }
 0x43d   :  { %v1908_v43 = vpop.eup %1907 }
 0x43e   :  { %v888_v14 = vadd.f32 1.0, %v1908_v43  ;;  %v1910_v45 = vpop.eup %1909 }
 0x43f   :  { %v889_v35 = vadd.f32 1.0, %v1910_v45 }
 0x440   :  { %1911 = vrcp.f32 %v888_v14 }
 0x441   :  { %1913 = vrcp.f32 %v889_v35 }
 0x44a   :  { %v1912_v53 = vpop.eup %1911 }
 0x44b   :  { %v895_v42 = vmul.f32 %v1912_v53, %v894_v49  ;;  %v1914_v51 = vpop.eup %1913  ;;  %v2519_v49 = vld [vmem:[#allocation3] ss:$12 sps:$4 sm:$0xff]   ;;  %v2530_v53 = vld [vmem:[#allocation3 + $0x18] ss:$12 sps:$4 sm:$0xff]  }
 0x44c   :  { %v898_v44 = vsub.f32 1.0, %v1914_v51  ;;  %v900_v61 = vmul.f32 %v1914_v51, %v2427_v37 }
 0x44d   :  { %v896_v56 = vadd.f32 %v895_v42, %v2299_v60  ;;  %v2534_v42 = vld [vmem:[#allocation3 + $0x34] ss:$12 sps:$4 sm:$0xff]  }
 0x44f   :  { %1915 = vtanh.f32 %v896_v56  ;;  %v2542_v56 = vld [vmem:[#allocation3 + $0x4c] ss:$12 sps:$4 sm:$0xff]  }
 0x459   :  { %v1916_v47 = vpop.eup %1915 }
 0x45a   :  { %v899_v52 = vmul.f32 %v1916_v47, %v898_v44 }
 0x45c   :  { %v2471_v62 = vadd.f32 %v900_v61, %v899_v52 }
 0x45e   :  { %v908_v39 = vpack.c.bf16 %v2471_v62, %v2471_v62 }
 0x460   :  { %942 = vmatmul.mubr.bf16.vlgmr.msra.gmra.mrb[32].mxu0 %v908_v39  ;;  %1736 = vmatmul.mubr.bf16.vlgmr.msra.gmra.mrb[24].mxu1 %v908_v39 }
 0x461   :  { %1020 = vmatpush1.bf16.msra.mxu0 %v2135_v5  ;;  %1740 = vmatpush3.bf16.msra.mxu1 %v2173_v17 }
 0x462   :  { %1021 = vmatprep.subr.bf16.mxu0 %v2137_v6  ;;  %1741 = vmatprep.subr.bf16.mxu1 %v2644_v48 }
 0x463   :  { %1051 = vmatprep.mubr.bf16.mxu0 %v2645_v58  ;;  %1755 = vmatprep.mubr.msk.bf16.mxu1 %vm2057_vm1, %v2644_v48 }
 0x465   :  { %1022 = vmatpush1.bf16.msra.mxu0 %v2143_v7  ;;  %1742 = vmatpush3.bf16.msra.mxu1 %v2177_v18 }
 0x466   :  { %1023 = vmatprep.subr.bf16.mxu0 %v2147_v8  ;;  %1743 = vmatprep.subr.bf16.mxu1 %v2644_v48 }
 0x469   :  { %1024 = vmatpush1.bf16.msra.mxu0 %v2152_v10  ;;  %1744 = vmatpush3.bf16.msra.mxu1 %v2191_v22 }
 0x46a   :  { %1025 = vmatprep.subr.bf16.mxu0 %v2159_v12  ;;  %1745 = vmatprep.subr.bf16.mxu1 %v2644_v48 }
 0x46d   :  { %1026 = vmatpush1.bf16.msra.mxu0 %v2162_v13  ;;  %1746 = vmatpush3.bf16.msra.mxu1 %v2204_v26 }
 0x46e   :  { %1027 = vmatprep.subr.bf16.mxu0 %v2169_v15  ;;  %1747 = vmatprep.subr.bf16.mxu1 %v2644_v48 }
 0x471   :  { %1028 = vmatpush1.bf16.msra.mxu0 %v2181_v19  ;;  %1748 = vmatpush3.bf16.msra.mxu1 %v2217_v28 }
 0x472   :  { %1029 = vmatprep.subr.bf16.mxu0 %v2185_v20  ;;  %1749 = vmatprep.subr.bf16.mxu1 %v2644_v48 }
 0x475   :  { %1030 = vmatpush1.bf16.msra.mxu0 %v2187_v21  ;;  %1750 = vmatpush3.bf16.msra.mxu1 %v2226_v30 }
 0x476   :  { %1031 = vmatprep.subr.bf16.mxu0 %v2199_v24  ;;  %1751 = vmatprep.subr.bf16.mxu1 %v2644_v48 }
 0x479   :  { %1032 = vmatpush1.bf16.msra.mxu0 %v2202_v25  ;;  %1752 = vmatpush3.bf16.msra.mxu1 %v2233_v31 }
 0x47a   :  { %1033 = vmatprep.subr.bf16.mxu0 %v2207_v27  ;;  %1753 = vmatprep.subr.bf16.mxu1 %v2644_v48 }
 0x47d   :  { %1034 = vmatpush1.bf16.msra.mxu0 %v2220_v29  ;;  %1754 = vmatpush3.bf16.msra.mxu1 %v2240_v32 }
 0x47e   :  { %1129 = vmatprep.subr.bf16.mxu0 %v2133_v4  ;;  %1759 = vmatprep.subr.bf16.mxu1 %v2644_v48 }
 0x533   :  { %v943_v5 = vpop.f32.mrb[32].mxu0  ;;  %v984_v6 = vpop.f32.mrb[24].mxu1 }
 0x534   :  { %v990_v7 = vadd.f32 %v943_v5, %v2304_v1  ;;  %v945_v8 = vpop.f32.mrb[33].mxu0  ;;  %v1737_v10 = vpop.f32.mrb[25].mxu1  ;;  %v1004_v2 = vadd.f32 %v2335_v38, %v984_v6 }
 0x535   :  { %v991_v12 = vadd.f32 %v945_v8, %v2306_v3  ;;  %v947_v60 = vpop.f32.mrb[34].mxu0  ;;  %v987_v37 = vpop.f32.mrb[26].mxu1 }
 0x536   :  { %v1526_v57 = vmul.f32 -1.442695, %v990_v7  ;;  %v948_v55 = vpop.f32.mrb[35].mxu0  ;;  %v1738_v23 = vpop.f32.mrb[27].mxu1  ;;  %v1964_v37 = vld [vmem:[#allocation3 + $0x8] ss:$12 sps:$4 sm:$0xff]  }
 0x537   :  { %v1527_v40 = vmul.f32 -1.442695, %v991_v12  ;;  %v1968_v55 = vld [vmem:[#allocation3 + $0x50] ss:$12 sps:$4 sm:$0xff]  }
 0x538   :  { %1917 = vpow2.f32 %v1526_v57  ;;  %v1966_v57 = vld [vmem:[#allocation3 + $0x38] ss:$12 sps:$4 sm:$0xff]  }
 0x539   :  { %1919 = vpow2.f32 %v1527_v40  ;;  %v1969_v23 = vld [vmem:[#allocation3 + $0x64] ss:$12 sps:$4 sm:$0xff]   ;;  %v1970_v40 = vld [vmem:[#allocation3 + $0x60] ss:$12 sps:$4 sm:$0xff]  }
 0x542   :  { %v1918_v16 = vpop.eup %1917 }
 0x543   :  { %v998_v4 = vadd.f32 1.0, %v1918_v16  ;;  %v1920_v0 = vpop.eup %1919  ;;  %v1971_v16 = vld [vmem:[#allocation3 + $0x7c] ss:$12 sps:$4 sm:$0xff]  }
 0x544   :  { %v999_v41 = vadd.f32 1.0, %v1920_v0  ;;  %v1973_v0 = vld [vmem:[#allocation3 + $0x94] ss:$12 sps:$4 sm:$0xff]  }
 0x545   :  { %1921 = vrcp.f32 %v998_v4  ;;  %v1972_v4 = vld [vmem:[#allocation3 + $0x78] ss:$12 sps:$4 sm:$0xff]  }
 0x546   :  { %1923 = vrcp.f32 %v999_v41  ;;  %v1974_v41 = vld [vmem:[#allocation3 + $0x90] ss:$12 sps:$4 sm:$0xff]  }
 0x54f   :  { %v1922_v1 = vpop.eup %1921 }
 0x550   :  { %v1005_v34 = vmul.f32 %v1922_v1, %v1004_v2  ;;  %v1924_v9 = vpop.eup %1923  ;;  %v1975_v2 = vld [vmem:[#allocation3 + $0xac] ss:$12 sps:$4 sm:$0xff]  }
 0x551   :  { %v1008_v59 = vsub.f32 1.0, %v1924_v9  ;;  %v1010_v14 = vmul.f32 %v1924_v9, %v2471_v62 }
 0x552   :  { %v1006_v3 = vadd.f32 %v1005_v34, %v2316_v36  ;;  %v2523_v36 = vld [vmem:[#allocation3 + $0x1c] ss:$12 sps:$4 sm:$0xff]  }
 0x554   :  { %1925 = vtanh.f32 %v1006_v3 }
 0x55e   :  { %v1926_v54 = vpop.eup %1925 }
 0x55f   :  { %v1009_v43 = vmul.f32 %v1926_v54, %v1008_v59  ;;  %v2646_v59 = vld [vmem:[#allocation14_spill] sm:$0xff] }
 0x561   :  { %v2515_v45 = vadd.f32 %v1010_v14, %v1009_v43 }
 0x563   :  { %v1018_v35 = vpack.c.bf16 %v2515_v45, %v2515_v45 }
 0x565   :  { %1052 = vmatmul.mubr.bf16.vlgmr.msra.gmra.mrb[36].mxu0 %v1018_v35  ;;  %1756 = vmatmul.mubr.bf16.vlgmr.msra.gmra.mrb[28].mxu1 %v1018_v35 }
 0x566   :  { %1130 = vmatpush1.bf16.msra.mxu0 %v2519_v49  ;;  %1760 = vmatpush3.bf16.msra.mxu1 %v2173_v17  ;;  %v2538_v17 = vld [vmem:[#allocation3 + $0x30] ss:$12 sps:$4 sm:$0xff]  }
 0x567   :  { %1131 = vmatprep.subr.bf16.mxu0 %v2523_v36  ;;  %1761 = vmatprep.subr.bf16.mxu1 %v2644_v48 }
 0x568   :  { %1161 = vmatprep.mubr.bf16.mxu0 %v2645_v58  ;;  %1775 = vmatprep.mubr.msk.bf16.mxu1 %vm2057_vm1, %v2644_v48 }
 0x56a   :  { %1132 = vmatpush1.bf16.msra.mxu0 %v2530_v53  ;;  %1762 = vmatpush3.bf16.msra.mxu1 %v2177_v18 }
 0x56b   :  { %1133 = vmatprep.subr.bf16.mxu0 %v2534_v42  ;;  %1763 = vmatprep.subr.bf16.mxu1 %v2644_v48 }
 0x56e   :  { %1134 = vmatpush1.bf16.msra.mxu0 %v2538_v17  ;;  %1764 = vmatpush3.bf16.msra.mxu1 %v2191_v22 }
 0x56f   :  { %1135 = vmatprep.subr.bf16.mxu0 %v2542_v56  ;;  %1765 = vmatprep.subr.bf16.mxu1 %v2644_v48 }
 0x572   :  { %1136 = vmatpush1.bf16.msra.mxu0 %v2162_v13  ;;  %1766 = vmatpush3.bf16.msra.mxu1 %v2204_v26  ;;  %v1963_v13 = vld [vmem:[#allocation3 + $0x4] ss:$12 sps:$4 sm:$0xff]  }
 0x573   :  { %1137 = vmatprep.subr.bf16.mxu0 %v2169_v15  ;;  %1767 = vmatprep.subr.bf16.mxu1 %v2644_v48 }
 0x576   :  { %1138 = vmatpush1.bf16.msra.mxu0 %v2181_v19  ;;  %1768 = vmatpush3.bf16.msra.mxu1 %v2217_v28 }
 0x577   :  { %1139 = vmatprep.subr.bf16.mxu0 %v2185_v20  ;;  %1769 = vmatprep.subr.bf16.mxu1 %v2644_v48 }
 0x57a   :  { %1140 = vmatpush1.bf16.msra.mxu0 %v2187_v21  ;;  %1770 = vmatpush3.bf16.msra.mxu1 %v2226_v30 }
 0x57b   :  { %1141 = vmatprep.subr.bf16.mxu0 %v2199_v24  ;;  %1771 = vmatprep.subr.bf16.mxu1 %v2644_v48 }
 0x57e   :  { %1142 = vmatpush1.bf16.msra.mxu0 %v2202_v25  ;;  %1772 = vmatpush3.bf16.msra.mxu1 %v2233_v31 }
 0x57f   :  { %1143 = vmatprep.subr.bf16.mxu0 %v2207_v27  ;;  %1773 = vmatprep.subr.bf16.mxu1 %v2644_v48 }
 0x582   :  { %1144 = vmatpush1.bf16.msra.mxu0 %v2220_v29  ;;  %1774 = vmatpush3.bf16.msra.mxu1 %v2240_v32 }
 0x583   :  { %1239 = vmatprep.subr.bf16.mxu0 %v1963_v13  ;;  %1779 = vmatprep.subr.bf16.mxu1 %v2644_v48  ;;  %v2647_v13 = vld [vmem:[#allocation12_spill] sm:$0xff] }
 0x638   :  { %v1053_v15 = vpop.f32.mrb[36].mxu0  ;;  %v1094_v18 = vpop.f32.mrb[28].mxu1 }
 0x639   :  { %v1100_v19 = vadd.f32 %v1053_v15, %v2308_v11  ;;  %v1055_v20 = vpop.f32.mrb[37].mxu0  ;;  %v1757_v21 = vpop.f32.mrb[29].mxu1  ;;  %v1114_v62 = vadd.f32 %v2335_v38, %v1094_v18 }
 0x63a   :  { %v1101_v22 = vadd.f32 %v1055_v20, %v2310_v33  ;;  %v1057_v24 = vpop.f32.mrb[38].mxu0  ;;  %v1097_v25 = vpop.f32.mrb[30].mxu1 }
 0x63b   :  { %v1528_v26 = vmul.f32 -1.442695, %v1100_v19  ;;  %v1058_v27 = vpop.f32.mrb[39].mxu0  ;;  %v1758_v51 = vpop.f32.mrb[31].mxu1 }
 0x63c   :  { %v1529_v29 = vmul.f32 -1.442695, %v1101_v22  ;;  %v1870_v27 = vld [vmem:[#allocation6 + $0x8] sm:$0xff]   ;;  %v1871_v51 = vld [vmem:[#allocation6 + $0x10] sm:$0xff]  }
 0x63d   :  { %1927 = vpow2.f32 %v1528_v26  ;;  %v1869_v26 = vld [vmem:[#allocation6] sm:$0xff]  }
 0x63e   :  { %1929 = vpow2.f32 %v1529_v29  ;;  %v1872_v29 = vld [vmem:[#allocation6 + $0x18] sm:$0xff]  }
 0x647   :  { %v1928_v44 = vpop.eup %1927 }
 0x648   :  { %v1108_v47 = vadd.f32 1.0, %v1928_v44  ;;  %v1930_v52 = vpop.eup %1929  ;;  %v1873_v44 = vld [vmem:[#allocation6 + $0x20] sm:$0xff]  }
 0x649   :  { %v1109_v61 = vadd.f32 1.0, %v1930_v52  ;;  %v1875_v52 = vld [vmem:[#allocation6 + $0x30] sm:$0xff]  }
 0x64a   :  { %1931 = vrcp.f32 %v1108_v47  ;;  %v1874_v47 = vld [vmem:[#allocation6 + $0x28] sm:$0xff]  }
 0x64b   :  { %1933 = vrcp.f32 %v1109_v61  ;;  %v1876_v61 = vld [vmem:[#allocation6 + $0x38] sm:$0xff]  }
 0x654   :  { %v1932_v11 = vpop.eup %1931 }
 0x655   :  { %v1115_v39 = vmul.f32 %v1932_v11, %v1114_v62  ;;  %v1934_v5 = vpop.eup %1933 }
 0x656   :  { %v1118_v6 = vsub.f32 1.0, %v1934_v5  ;;  %v1120_v10 = vmul.f32 %v1934_v5, %v2515_v45 }
 0x657   :  { %v1116_v33 = vadd.f32 %v1115_v39, %v2322_v46  ;;  %v1965_v46 = vld [vmem:[#allocation3 + $0x20] ss:$12 sps:$4 sm:$0xff]  }
 0x658   :  { %v2648_v39 = vld [vmem:[#allocation15_spill] sm:$0xff] }
 0x659   :  { %1935 = vtanh.f32 %v1116_v33 }
 0x663   :  { %v1936_v7 = vpop.eup %1935 }
 0x664   :  { %v1119_v8 = vmul.f32 %v1936_v7, %v1118_v6 }
 0x666   :  { %v2570_v12 = vadd.f32 %v1120_v10, %v1119_v8 }
 0x668   :  { %v1128_v60 = vpack.c.bf16 %v2570_v12, %v2570_v12 }
 0x66a   :  { %1162 = vmatmul.mubr.bf16.vlgmr.msra.gmra.mrb[40].mxu0 %v1128_v60  ;;  %1776 = vmatmul.mubr.bf16.vlgmr.msra.gmra.mrb[32].mxu1 %v1128_v60 }
 0x66b   :  { %1240 = vmatpush1.bf16.msra.mxu0 %v2519_v49  ;;  %1780 = vmatpush3.bf16.msra.mxu1 %v1964_v37 }
 0x66c   :  { %1241 = vmatprep.subr.bf16.mxu0 %v2523_v36  ;;  %1781 = vmatprep.subr.bf16.mxu1 %v2644_v48 }
 0x66d   :  { %1271 = vmatprep.mubr.bf16.mxu0 %v2645_v58  ;;  %1795 = vmatprep.mubr.msk.bf16.mxu1 %vm2057_vm1, %v2644_v48  ;;  %v1967_v58 = vld [vmem:[#allocation3 + $0x48] ss:$12 sps:$4 sm:$0xff]  }
 0x66f   :  { %1242 = vmatpush1.bf16.msra.mxu0 %v2530_v53  ;;  %1782 = vmatpush3.bf16.msra.mxu1 %v1965_v46 }
 0x670   :  { %1243 = vmatprep.subr.bf16.mxu0 %v2534_v42  ;;  %1783 = vmatprep.subr.bf16.mxu1 %v2644_v48 }
 0x673   :  { %1244 = vmatpush1.bf16.msra.mxu0 %v2538_v17  ;;  %1784 = vmatpush3.bf16.msra.mxu1 %v1966_v57 }
 0x674   :  { %1245 = vmatprep.subr.bf16.mxu0 %v2542_v56  ;;  %1785 = vmatprep.subr.bf16.mxu1 %v2644_v48 }
 0x677   :  { %1246 = vmatpush1.bf16.msra.mxu0 %v1967_v58  ;;  %1786 = vmatpush3.bf16.msra.mxu1 %v1968_v55 }
 0x678   :  { %1247 = vmatprep.subr.bf16.mxu0 %v1969_v23  ;;  %1787 = vmatprep.subr.bf16.mxu1 %v2644_v48 }
 0x67b   :  { %1248 = vmatpush1.bf16.msra.mxu0 %v1970_v40  ;;  %1788 = vmatpush3.bf16.msra.mxu1 %v2217_v28  ;;  %v1976_v28 = vld [vmem:[#allocation3 + $0xa8] ss:$12 sps:$4 sm:$0xff]  }
 0x67c   :  { %1249 = vmatprep.subr.bf16.mxu0 %v1971_v16  ;;  %1789 = vmatprep.subr.bf16.mxu1 %v2644_v48 }
 0x67f   :  { %1250 = vmatpush1.bf16.msra.mxu0 %v1972_v4  ;;  %1790 = vmatpush3.bf16.msra.mxu1 %v2226_v30  ;;  %v2649_v4 = vld [vmem:[#allocation13_spill] sm:$0xff] }
 0x680   :  { %1251 = vmatprep.subr.bf16.mxu0 %v1973_v0  ;;  %1791 = vmatprep.subr.bf16.mxu1 %v2644_v48 }
 0x683   :  { %1252 = vmatpush1.bf16.msra.mxu0 %v1974_v41  ;;  %1792 = vmatpush3.bf16.msra.mxu1 %v2233_v31 }
 0x684   :  { %1253 = vmatprep.subr.bf16.mxu0 %v1975_v2  ;;  %1793 = vmatprep.subr.bf16.mxu1 %v2644_v48 }
 0x687   :  { %1254 = vmatpush1.bf16.msra.mxu0 %v1976_v28  ;;  %1794 = vmatpush3.bf16.msra.mxu1 %v2240_v32 }
 0x688   :  { %1799 = vmatprep.subr.bf16.mxu0 %v2644_v48 }
 0x73d   :  { %v1163_v1 = vpop.f32.mrb[40].mxu0  ;;  %v1204_v30 = vpop.f32.mrb[32].mxu1 }
 0x73e   :  { %v1210_v34 = vadd.f32 %v1163_v1, %v2324_v50  ;;  %v1165_v3 = vpop.f32.mrb[41].mxu0  ;;  %v1777_v9 = vpop.f32.mrb[33].mxu1  ;;  %v1224_v17 = vadd.f32 %v2335_v38, %v1204_v30 }
 0x73f   :  { %v1211_v54 = vadd.f32 %v1165_v3, %v2646_v59  ;;  %v1167_v43 = vpop.f32.mrb[42].mxu0  ;;  %v1207_v31 = vpop.f32.mrb[34].mxu1  ;;  %v1534_v3 = vld [vmem:[%s2634_s6] ss:$0 sm:$0xff] }
 0x740   :  { %v1530_v14 = vmul.f32 -1.442695, %v1210_v34  ;;  %v1168_v45 = vpop.f32.mrb[43].mxu0  ;;  %v1778_v35 = vpop.f32.mrb[35].mxu1 }
 0x741   :  { %v1531_v49 = vmul.f32 -1.442695, %v1211_v54 }
 0x742   :  { %1937 = vpow2.f32 %v1530_v14 }
 0x743   :  { %1939 = vpow2.f32 %v1531_v49 }
 0x74c   :  { %v1938_v36 = vpop.eup %1937 }
 0x74d   :  { %v1218_v32 = vadd.f32 1.0, %v1938_v36  ;;  %v1940_v53 = vpop.eup %1939 }
 0x74e   :  { %v1219_v42 = vadd.f32 1.0, %v1940_v53 }
 0x74f   :  { %1941 = vrcp.f32 %v1218_v32 }
 0x750   :  { %1943 = vrcp.f32 %v1219_v42 }
 0x759   :  { %v1942_v50 = vpop.eup %1941 }
 0x75a   :  { %v1225_v56 = vmul.f32 %v1942_v50, %v1224_v17  ;;  %v1944_v18 = vpop.eup %1943 }
 0x75b   :  { %v1228_v19 = vsub.f32 1.0, %v1944_v18  ;;  %v1230_v22 = vmul.f32 %v1944_v18, %v2570_v12 }
 0x75c   :  { %v1226_v15 = vadd.f32 %v1225_v56, %v2647_v13 }
 0x75e   :  { %1945 = vtanh.f32 %v1226_v15 }
 0x768   :  { %v1946_v20 = vpop.eup %1945 }
 0x769   :  { %v1229_v21 = vmul.f32 %v1946_v20, %v1228_v19 }
 0x76b   :  { %v1231_v24 = vadd.f32 %v1230_v22, %v1229_v21 }
 0x76d   :  { %v1238_v25 = vpack.c.bf16 %v1231_v24, %v1231_v24 }
 0x76f   :  { %1272 = vmatmul.mubr.bf16.vlgmr.msra.gmra.mrb[44].mxu0 %v1238_v25  ;;  %1796 = vmatmul.mubr.bf16.vlgmr.msra.gmra.mrb[36].mxu1 %v1238_v25 }
 0x770   :  { %1815 = vmatprep.mubr.msk.bf16.mxu0 %vm2057_vm1, %v2644_v48  ;;  %1800 = vmatpush3.bf16.msra.mxu0 %v1869_v26 }
 0x771   :  { %1801 = vmatprep.subr.bf16.mxu0 %v2644_v48 }
 0x774   :  { %1802 = vmatpush3.bf16.msra.mxu0 %v1870_v27 }
 0x775   :  { %1803 = vmatprep.subr.bf16.mxu0 %v2644_v48 }
 0x778   :  { %1804 = vmatpush3.bf16.msra.mxu0 %v1871_v51 }
 0x779   :  { %1805 = vmatprep.subr.bf16.mxu0 %v2644_v48 }
 0x77c   :  { %1806 = vmatpush3.bf16.msra.mxu0 %v1872_v29 }
 0x77d   :  { %1807 = vmatprep.subr.bf16.mxu0 %v2644_v48 }
 0x780   :  { %1808 = vmatpush3.bf16.msra.mxu0 %v1873_v44 }
 0x781   :  { %1809 = vmatprep.subr.bf16.mxu0 %v2644_v48 }
 0x784   :  { %1810 = vmatpush3.bf16.msra.mxu0 %v1874_v47 }
 0x785   :  { %1811 = vmatprep.subr.bf16.mxu0 %v2644_v48 }
 0x788   :  { %1812 = vmatpush3.bf16.msra.mxu0 %v1875_v52 }
 0x789   :  { %1813 = vmatprep.subr.bf16.mxu0 %v2644_v48 }
 0x78c   :  { %1814 = vmatpush3.bf16.msra.mxu0 %v1876_v61 }
 0x842   :  { %v1273_v62 = vpop.f32.mrb[44].mxu0  ;;  %v1314_v11 = vpop.f32.mrb[36].mxu1 }
 0x843   :  { %v1320_v33 = vadd.f32 %v1273_v62, %v2648_v39  ;;  %v1275_v5 = vpop.f32.mrb[45].mxu0  ;;  %v1797_v6 = vpop.f32.mrb[37].mxu1  ;;  %v1334_v23 = vadd.f32 %v2335_v38, %v1314_v11 }
 0x844   :  { %v1321_v7 = vadd.f32 %v1275_v5, %v2330_v63  ;;  %v1277_v8 = vpop.f32.mrb[46].mxu0  ;;  %v1317_v10 = vpop.f32.mrb[38].mxu1 }
 0x845   :  { %v1532_v12 = vmul.f32 -1.442695, %v1320_v33  ;;  %v1278_v60 = vpop.f32.mrb[47].mxu0  ;;  %v1798_v37 = vpop.f32.mrb[39].mxu1 }
 0x846   :  { %v1533_v46 = vmul.f32 -1.442695, %v1321_v7 }
 0x847   :  { %1947 = vpow2.f32 %v1532_v12 }
 0x848   :  { %1949 = vpow2.f32 %v1533_v46 }
 0x851   :  { %v1948_v57 = vpop.eup %1947 }
 0x852   :  { %v1328_v58 = vadd.f32 1.0, %v1948_v57  ;;  %v1950_v48 = vpop.eup %1949 }
 0x853   :  { %v1329_v55 = vadd.f32 1.0, %v1950_v48 }
 0x854   :  { %1951 = vrcp.f32 %v1328_v58 }
 0x855   :  { %1953 = vrcp.f32 %v1329_v55 }
 0x85e   :  { %v1952_v40 = vpop.eup %1951 }
 0x85f   :  { %v1335_v16 = vmul.f32 %v1952_v40, %v1334_v23  ;;  %v1954_v0 = vpop.eup %1953 }
 0x860   :  { %v1338_v41 = vsub.f32 1.0, %v1954_v0  ;;  %v1340_v1 = vmul.f32 %v1954_v0, %v1231_v24 }
 0x861   :  { %v1336_v63 = vadd.f32 %v1335_v16, %v2649_v4 }
 0x863   :  { %1955 = vtanh.f32 %v1336_v63 }
 0x86d   :  { %v1956_v2 = vpop.eup %1955 }
 0x86e   :  { %v1339_v28 = vmul.f32 %v1956_v2, %v1338_v41 }
 0x870   :  { %v1341_v30 = vadd.f32 %v1340_v1, %v1339_v28 }
 0x872   :  { %v1342_v34 = vpack.c.bf16 %v1341_v30, %v1341_v30 }
 0x874   :  { %1816 = vmatmul.mubr.bf16.vlgmr.msra.gmra.mrb[48].mxu0 %v1342_v34 }
 0x947   :  { %v1448_v38 = vpop.f32.mrb[48].mxu0 }
 0x948   :  { %v1449_v9 = vadd.f32 %v1534_v3, %v1448_v38  ;;  %v1817_v59 = vpop.f32.mrb[49].mxu0 }
 0x949   :  { %v1451_v54 = vpop.f32.mrb[50].mxu0 }
 0x94a   :  { %1454 = vst [vmem:[#allocation8] sm:$0xff] %v1449_v9  ;;  %v1818_v43 = vpop.f32.mrb[51].mxu0 }
 0x94b   :  { %2032 = shalt.err (!%p2029_p6)
}
 0x94c   :  { %s2033_s6 = scalar_lea.hbm %s2635_s7, 128 }
 0x94d   :  { %p2034_p7 = scmp.ne.s32.totalorder %s2635_s7, %s2033_s6  ;;  %p2037_p8 = scmp.lt.u32.totalorder %s2033_s6, %s2635_s7 }
 0x94f   :  { %p2039_p9 = pnand %p2037_p8, %p2034_p7 }
 0x951   :  { %2042 = shalt.err (!%p2039_p9)
}
 0x952   :  { %1464 = dma.vmem_to_hbm [thread:$0]  %s1462_s21, 128, %s2635_s7, [#allocation5]  }
 0x953   :  { %2047 = dma.done.wait [#allocation5], 128  }
 0x954   :  { %2048 = vsyncadd [#allocation5], 4294967168 }
 0x955   :  { %1468 = vsyncpa [#allocation4], 1 }
 0x956   :  { %1469 = vsyncpa [#allocation7], 1 }
 0x957   :  { %1470 = vsyncpa [#allocation5], 1 }

</bundles_post_ra>
